<compile_context>
chip_gen: v7x
topology: tpu7x:2x2x1
jax: 0.10.0
libtpu: 0.0.40
codegen_flags: <defaults>
</compile_context>

<pallas_src>
import functools
import numpy as np
import jax
import jax.numpy as jnp
from jax.experimental import pallas as pl
from jax.experimental.pallas import tpu as pltpu

LANES = 128


def _round_up(v, m):
    return ((v + m - 1) // m) * m


# --------------------------- packed weight layout ---------------------------


def _make_layout(x_dim, a_dim, h_dim, z_dim, n_layers):
    """Dense (row, col) layout of the packed weight slab.

    Each fused block occupies rows [r0, r0+K) x cols [c0, c0+N) (weight
    [K, N]) plus one bias row at r0+K when has_bias.  Blocks in the same
    row-band group are co-located side by side in the 128 lanes.
    """
    h, a, z, x = h_dim, a_dim, z_dim, x_dim
    assert 4 * h <= LANES, (
        "GRU gate fusion needs 4*h_dim <= 128 lanes; larger h_dim would need "
        "the fused block split over multiple lane groups.")
    assert 2 * h <= LANES and h + 2 * z <= LANES and 2 * z <= LANES
    assert n_layers + 1 <= 8 and n_layers + 3 <= 8
    assert x + a + 1 <= LANES

    blocks = [
        # (name, K, N, has_bias, row_band_group)
        ("ep1",    2 * h + a, 2 * h,     True,  "wide"),    # enc.0 | prior.0
        ("dec1",   2 * h + a, h,         True,  "wide"),
        ("ep2",    2 * h,     h + 2 * z, True,  "ep2"),     # enc.2 | pr_mean | pr_std
        ("phi_x1", x,         h,         True,  "narrow"),
        ("phi_z",  z,         h,         True,  "narrow"),
        ("phi_x2", h,         h,         True,  "hband"),
        ("enc_ms", h,         2 * z,     True,  "hband"),   # enc_mean | enc_std
        ("dec2",   h,         h,         True,  "hband"),
        ("dec3",   h,         x,         True,  "hband"),
        ("policy", h,         a,         True,  "hband"),
    ]
    for l in range(n_layers):
        in_l = 2 * h if l == 0 else h
        blocks.append((f"gru_{l}", in_l + h, 4 * h, False, f"gru_{l}"))

    bands = []            # each: {"col": used_cols, "rows": max_rows}
    group_bands = {}      # group -> [band indices]
    placement = {}        # name -> (band_idx, col, K, N, has_bias)
    for name, K, N, hb, grp in blocks:
        assert N <= LANES, f"fused block {name} is wider than one lane group"
        rows_k = K + (1 if hb else 0)
        bi = None
        for cand in group_bands.get(grp, []):
            if bands[cand]["col"] + N <= LANES:
                bi = cand
                break
        if bi is None:
            bi = len(bands)
            bands.append({"col": 0, "rows": 0})
            group_bands.setdefault(grp, []).append(bi)
        placement[name] = (bi, bands[bi]["col"], K, N, hb)
        bands[bi]["col"] += N
        bands[bi]["rows"] = max(bands[bi]["rows"], rows_k)

    band_row, off = [], 0
    for b in bands:
        band_row.append(off)
        off += _round_up(b["rows"], 16)   # 16-row bands: friendly to bf16 packing
    layout = {name: (band_row[bi], col, K, N, hb)
              for name, (bi, col, K, N, hb) in placement.items()}
    return layout, _round_up(off, 16), LANES


def init_params(key, x_dim, a_dim, h_dim, z_dim, n_layers, stdv=0.1):
    """Parameters in the original (un-fused) PyTorch-like layout, with every
    Linear weight pre-transposed to [in_features, out_features]."""
    keys = iter(jax.random.split(key, 64))

    def w(shape):
        return jax.random.normal(next(keys), shape, jnp.float32) * stdv

    P = {}
    P["phi_x.0.w"], P["phi_x.0.b"] = w((x_dim, h_dim)), w((h_dim,))
    P["phi_x.2.w"], P["phi_x.2.b"] = w((h_dim, h_dim)), w((h_dim,))
    P["enc.0.w"], P["enc.0.b"] = w((2 * h_dim + a_dim, h_dim)), w((h_dim,))
    P["enc.2.w"], P["enc.2.b"] = w((h_dim, h_dim)), w((h_dim,))
    P["enc_mean.w"], P["enc_mean.b"] = w((h_dim, z_dim)), w((z_dim,))
    P["enc_std.w"], P["enc_std.b"] = w((h_dim, z_dim)), w((z_dim,))
    P["prior.0.w"], P["prior.0.b"] = w((h_dim + a_dim, h_dim)), w((h_dim,))
    P["prior_mean.w"], P["prior_mean.b"] = w((h_dim, z_dim)), w((z_dim,))
    P["prior_std.w"], P["prior_std.b"] = w((h_dim, z_dim)), w((z_dim,))
    P["phi_z.0.w"], P["phi_z.0.b"] = w((z_dim, h_dim)), w((h_dim,))
    P["dec.0.w"], P["dec.0.b"] = w((2 * h_dim + a_dim, h_dim)), w((h_dim,))
    P["dec.2.w"], P["dec.2.b"] = w((h_dim, h_dim)), w((h_dim,))
    P["dec.4.w"], P["dec.4.b"] = w((h_dim, x_dim)), w((x_dim,))
    P["policy.0.w"], P["policy.0.b"] = w((h_dim, a_dim)), w((a_dim,))
    for l in range(n_layers):
        in_l = 2 * h_dim if l == 0 else h_dim
        P[f"rnn.w_ih_l{l}"] = w((in_l, 3 * h_dim))   # columns = [r | z | n]
        P[f"rnn.w_hh_l{l}"] = w((h_dim, 3 * h_dim))  # columns = [r | z | n]
    return P


def pack_params(P, x_dim, a_dim, h_dim, z_dim, n_layers):
    """Pack all (fused) weights + biases into one dense, tile-aligned bf16 slab."""
    layout, rows, cols = _make_layout(x_dim, a_dim, h_dim, z_dim, n_layers)
    slab = np.zeros((rows, cols), np.float32)
    h, a, z = h_dim, a_dim, z_dim

    def put(name, W, b=None):
        r0, c0, K, N, hb = layout[name]
        W = np.asarray(W, np.float32)
        assert W.shape == (K, N), (name, W.shape, (K, N))
        slab[r0:r0 + K, c0:c0 + N] = W
        if hb:
            slab[r0 + K, c0:c0 + N] = np.asarray(b, np.float32).reshape(N)

    put("phi_x1", P["phi_x.0.w"], P["phi_x.0.b"])
    put("phi_x2", P["phi_x.2.w"], P["phi_x.2.b"])

    # enc.0 | prior.0 column-fused behind cat([phi_x, h[-1], prev_a]);
    # prior does not see phi_x so those rows are zero in its column group.
    w_ep1 = np.zeros((2 * h + a, 2 * h), np.float32)
    w_ep1[:, :h] = np.asarray(P["enc.0.w"])
    w_ep1[h:, h:] = np.asarray(P["prior.0.w"])
    b_ep1 = np.concatenate([np.asarray(P["enc.0.b"]),
                            np.asarray(P["prior.0.b"])])
    put("ep1", w_ep1, b_ep1)

    # block-diag: enc.2 | (prior_mean | prior_std)
    w_ep2 = np.zeros((2 * h, h + 2 * z), np.float32)
    w_ep2[:h, :h] = np.asarray(P["enc.2.w"])
    w_ep2[h:, h:h + z] = np.asarray(P["prior_mean.w"])
    w_ep2[h:, h + z:] = np.asarray(P["prior_std.w"])
    b_ep2 = np.concatenate([np.asarray(P["enc.2.b"]),
                            np.asarray(P["prior_mean.b"]),
                            np.asarray(P["prior_std.b"])])
    put("ep2", w_ep2, b_ep2)

    # enc_mean | enc_std
    w_ms = np.concatenate([np.asarray(P["enc_mean.w"]),
                           np.asarray(P["enc_std.w"])], axis=1)
    b_ms = np.concatenate([np.asarray(P["enc_mean.b"]),
                           np.asarray(P["enc_std.b"])])
    put("enc_ms", w_ms, b_ms)

    put("phi_z", P["phi_z.0.w"], P["phi_z.0.b"])
    put("dec1", P["dec.0.w"], P["dec.0.b"])
    put("dec2", P["dec.2.w"], P["dec.2.b"])
    put("dec3", P["dec.4.w"], P["dec.4.b"])
    put("policy", P["policy.0.w"], P["policy.0.b"])

    # GRU per layer: ONE fused [in_l + h, 4h] block with column groups
    # [r | z | n_from_input | n_from_hidden]; r/z rows are stacked so
    # (gi + gh) for those gates comes out of a single dot.
    for l in range(n_layers):
        in_l = 2 * h if l == 0 else h
        wi = np.asarray(P[f"rnn.w_ih_l{l}"], np.float32)   # [in_l, 3h]
        wh = np.asarray(P[f"rnn.w_hh_l{l}"], np.float32)   # [h, 3h]
        wf = np.zeros((in_l + h, 4 * h), np.float32)
        wf[:in_l, :2 * h] = wi[:, :2 * h]
        wf[in_l:, :2 * h] = wh[:, :2 * h]
        wf[:in_l, 2 * h:3 * h] = wi[:, 2 * h:3 * h]
        wf[in_l:, 3 * h:4 * h] = wh[:, 2 * h:3 * h]
        put(f"gru_{l}", wf)

    # bf16 slab: halves the one-time HBM->VMEM weight DMA.
    return jnp.asarray(slab).astype(jnp.bfloat16)


# --------------------------------- kernel -----------------------------------


def _build_kernel(x_dim, a_dim, h_dim, z_dim, n_layers, layout):

    def kernel(acts_ref, h0_ref, w_ref, out_ref, h_state):
        t = pl.program_id(0)

        @pl.when(t == 0)
        def _():
            h_state[...] = h0_ref[...]

        dot = lambda u, v: jnp.dot(u, v, preferred_element_type=jnp.float32)
        relu = lambda v: jnp.maximum(v, 0.0)
        # sigmoid via a single EUP tanh (no divide on the VPU critical path)
        sigmoid = lambda v: 0.5 * jnp.tanh(0.5 * v) + 0.5
        softplus = lambda v: (jnp.maximum(v, 0.0)
                              + jnp.log1p(jnp.exp(-jnp.abs(v))))

        def W(name):
            r0, c0, K, N, _ = layout[name]
            return w_ref[r0:r0 + K, c0:c0 + N].astype(jnp.float32)

        def B(name):
            r0, c0, K, N, _ = layout[name]
            return w_ref[r0 + K:r0 + K + 1, c0:c0 + N].astype(jnp.float32)

        def linear(v, name):
            return dot(v, W(name)) + B(name)

        # ---- per-step streamed activations (one lane-dense 8x128 tile) ----
        x = acts_ref[0:1, :x_dim]
        prev_a = acts_ref[1:2, :a_dim]
        eps = acts_ref[2:3, :z_dim]
        h_last = h_state[n_layers - 1:n_layers, :h_dim]   # old top-layer state

        # ---- phi_x ----
        phi_x_t = relu(linear(relu(linear(x, "phi_x1")), "phi_x2"))

        # ---- enc.0 + prior.0 fused behind the shared concat ----
        c = jnp.concatenate([phi_x_t, h_last, prev_a], axis=1)    # [1, 2h+a]
        ep1 = relu(linear(c, "ep1"))                              # [enc1 | prior_t]
        ep2 = linear(ep1, "ep2")        # [enc2_pre | prior_mean | prior_std_pre]
        enc_t = relu(ep2[:, :h_dim])
        prior_mean = ep2[:, h_dim:h_dim + z_dim]
        prior_std = softplus(ep2[:, h_dim + z_dim:h_dim + 2 * z_dim])

        ms = linear(enc_t, "enc_ms")                              # [enc_mean | enc_std_pre]
        enc_mean = ms[:, :z_dim]
        enc_std = softplus(ms[:, z_dim:2 * z_dim])

        # ---- reparameterized sample (noise supplied from host) ----
        z_t = eps * enc_std + enc_mean
        phi_z_t = relu(linear(z_t, "phi_z"))

        # ---- dec ----
        d = jnp.concatenate([phi_z_t, h_last, prev_a], axis=1)
        dec_t = linear(relu(linear(relu(linear(d, "dec1")), "dec2")), "dec3")

        # ---- GRU (bias=False): ONE dot per layer, cols = [r | z | n_i | n_h] ----
        layer_in = jnp.concatenate([phi_x_t, phi_z_t], axis=1)
        new_h = []
        for l in range(n_layers):
            h_l = h_state[l:l + 1, :h_dim]
            g = dot(jnp.concatenate([layer_in, h_l], axis=1), W(f"gru_{l}"))
            r = sigmoid(g[:, :h_dim])
            zg = sigmoid(g[:, h_dim:2 * h_dim])
            ng = jnp.tanh(g[:, 2 * h_dim:3 * h_dim]
                          + r * g[:, 3 * h_dim:4 * h_dim])
            h_new = (1.0 - zg) * ng + zg * h_l
            new_h.append(h_new)
            layer_in = h_new

        a_out = jnp.tanh(linear(layer_in, "policy"))

        # ---- KLD (approx reciprocal -> EUP slot) ----
        inv_pvar = pl.reciprocal(prior_std * prior_std, approx=True)
        kld_el = (2.0 * jnp.log(prior_std) - 2.0 * jnp.log(enc_std)
                  + (enc_std * enc_std + (enc_mean - prior_mean) ** 2) * inv_pvar
                  - 1.0)
        kld = 0.5 * jnp.sum(kld_el)

        # ---- carry hidden state to the next grid step ----
        for l in range(n_layers):
            h_state[l:l + 1, :h_dim] = new_h[l]

        # ---- output tile: zero-init + sub-slice stores ----
        out_ref[...] = jnp.zeros_like(out_ref)
        out_ref[0:1, :x_dim] = dec_t
        out_ref[0:1, x_dim:x_dim + a_dim] = a_out
        out_ref[0:1, x_dim + a_dim:x_dim + a_dim + 1] = jnp.reshape(kld, (1, 1))
        for l in range(n_layers):
            out_ref[1 + l:2 + l, :h_dim] = new_h[l]

    return kernel


# -------------------------------- wrapper -----------------------------------


@functools.partial(jax.jit, static_argnames=("x_dim", "a_dim", "h_dim",
                                             "z_dim", "n_layers"))
def vrnn_rollout(xs, h0, prev_as, epss, w_slab, *, x_dim, a_dim, h_dim, z_dim,
                 n_layers):
    """Run T chained forward() steps in one pallas_call (grid=(T,))."""
    T = xs.shape[0]
    layout, rows, _ = _make_layout(x_dim, a_dim, h_dim, z_dim, n_layers)
    assert w_slab.shape == (rows, LANES)

    # per-step inputs packed once for the whole sequence (lane-dense tiles)
    acts = jnp.zeros((T, 8, LANES), jnp.float32)
    acts = acts.at[:, 0, :x_dim].set(xs.reshape(T, x_dim))
    acts = acts.at[:, 1, :a_dim].set(prev_as.reshape(T, a_dim))
    acts = acts.at[:, 2, :z_dim].set(epss.reshape(T, z_dim))
    hbuf = jnp.zeros((8, LANES), jnp.float32)
    hbuf = hbuf.at[:n_layers, :h_dim].set(h0.reshape(n_layers, h_dim))

    out = pl.pallas_call(
        _build_kernel(x_dim, a_dim, h_dim, z_dim, n_layers, layout),
        out_shape=jax.ShapeDtypeStruct((T, 8, LANES), jnp.float32),
        grid=(T,),
        in_specs=[
            pl.BlockSpec((None, 8, LANES), lambda t: (t, 0, 0)),  # per-step acts
            pl.BlockSpec((8, LANES), lambda t: (0, 0)),           # h0: DMA once
            pl.BlockSpec((rows, LANES), lambda t: (0, 0)),        # weights: DMA once
        ],
        out_specs=pl.BlockSpec((None, 8, LANES), lambda t: (t, 0, 0)),
        scratch_shapes=[pltpu.VMEM((8, LANES), jnp.float32)],     # carried hidden
        compiler_params=pltpu.CompilerParams(
            dimension_semantics=("arbitrary",)),                   # recurrence
    )(acts, hbuf, w_slab)

    dec = out[:, 0, :x_dim]                                  # [T, x_dim]
    a = out[:, 0, x_dim:x_dim + a_dim]                       # [T, a_dim]
    kld_steps = out[:, 0, x_dim + a_dim]                     # [T]
    h_final = out[T - 1, 1:1 + n_layers, :h_dim].reshape(n_layers, 1, h_dim)
    return dec, h_final, a, jnp.sum(kld_steps)


# --------------------------- pure-JAX reference -----------------------------


def vrnn_step_ref(x, h, prev_a, eps, P, n_layers):
    relu = lambda v: jnp.maximum(v, 0.0)
    sigmoid = lambda v: 1.0 / (1.0 + jnp.exp(-v))
    softplus = lambda v: jnp.maximum(v, 0.0) + jnp.log1p(jnp.exp(-jnp.abs(v)))

    h_all = h.reshape(n_layers, -1)
    hd = h_all.shape[-1]
    h_last = h_all[-1:, :]
    prev_a = prev_a.reshape(1, -1)

    phi_x_t = relu(relu(x @ P["phi_x.0.w"] + P["phi_x.0.b"])
                   @ P["phi_x.2.w"] + P["phi_x.2.b"])

    enc_in = jnp.concatenate([phi_x_t, h_last, prev_a], axis=1)
    enc_t = relu(relu(enc_in @ P["enc.0.w"] + P["enc.0.b"])
                 @ P["enc.2.w"] + P["enc.2.b"])
    enc_mean_t = enc_t @ P["enc_mean.w"] + P["enc_mean.b"]
    enc_std_t = softplus(enc_t @ P["enc_std.w"] + P["enc_std.b"])

    prior_in = jnp.concatenate([h_last, prev_a], axis=1)
    prior_t = relu(prior_in @ P["prior.0.w"] + P["prior.0.b"])
    prior_mean_t = prior_t @ P["prior_mean.w"] + P["prior_mean.b"]
    prior_std_t = softplus(prior_t @ P["prior_std.w"] + P["prior_std.b"])

    z_t = eps * enc_std_t + enc_mean_t
    phi_z_t = relu(z_t @ P["phi_z.0.w"] + P["phi_z.0.b"])

    dec_in = jnp.concatenate([phi_z_t, h_last, prev_a], axis=1)
    d1 = relu(dec_in @ P["dec.0.w"] + P["dec.0.b"])
    dec_t = relu(d1 @ P["dec.2.w"] + P["dec.2.b"]) @ P["dec.4.w"] + P["dec.4.b"]

    layer_in = jnp.concatenate([phi_x_t, phi_z_t], axis=1)
    h_rows = []
    for l in range(n_layers):
        gi = layer_in @ P[f"rnn.w_ih_l{l}"]
        gh = h_all[l:l + 1] @ P[f"rnn.w_hh_l{l}"]
        r = sigmoid(gi[:, :hd] + gh[:, :hd])
        zg = sigmoid(gi[:, hd:2 * hd] + gh[:, hd:2 * hd])
        ng = jnp.tanh(gi[:, 2 * hd:] + r * gh[:, 2 * hd:])
        h_new = (1.0 - zg) * ng + zg * h_all[l:l + 1]
        h_rows.append(h_new)
        layer_in = h_new

    a = jnp.tanh(layer_in @ P["policy.0.w"] + P["policy.0.b"])
    kld_el = (2.0 * jnp.log(prior_std_t) - 2.0 * jnp.log(enc_std_t)
              + (enc_std_t ** 2 + (enc_mean_t - prior_mean_t) ** 2)
              / (prior_std_t ** 2) - 1.0)
    kld = 0.5 * jnp.sum(kld_el)
    return (dec_t, jnp.concatenate(h_rows, 0).reshape(n_layers, 1, -1),
            a.reshape(1, 1, -1), kld)


# ---------------------------------- main ------------------------------------


if __name__ == "__main__":
    x_dim, a_dim, h_dim, z_dim, n_layers, T = 16, 8, 32, 16, 2, 8

    key = jax.random.PRNGKey(0)
    k_par, k_x, k_h, k_a, k_eps = jax.random.split(key, 5)

    params = init_params(k_par, x_dim, a_dim, h_dim, z_dim, n_layers)
    w_slab = pack_params(params, x_dim, a_dim, h_dim, z_dim, n_layers)

    xs = jax.random.normal(k_x, (T, 1, x_dim), jnp.float32)
    h0 = jax.random.normal(k_h, (n_layers, 1, h_dim), jnp.float32)
    prev_as = jax.random.normal(k_a, (T, 1, a_dim), jnp.float32)
    epss = jax.random.normal(k_eps, (T, 1, z_dim), jnp.float32)  # host-side noise

    dec, h_fin, a, kld = vrnn_rollout(
        xs, h0, prev_as, epss, w_slab,
        x_dim=x_dim, a_dim=a_dim, h_dim=h_dim, z_dim=z_dim, n_layers=n_layers)
    jax.block_until_ready((dec, h_fin, a, kld))

    # pure-JAX reference, step by step, with params rounded through bf16 so
    # both paths see identical parameter values.
    P_ref = {k: jnp.asarray(v).astype(jnp.bfloat16).astype(jnp.float32)
             for k, v in params.items()}
    h_ref = h0
    kld_ref = jnp.float32(0.0)
    dec_ref, a_ref = [], []
    for t in range(T):
        d_t, h_ref, a_t, kl_t = vrnn_step_ref(xs[t], h_ref, prev_as[t],
                                              epss[t], P_ref, n_layers)
        dec_ref.append(d_t)
        a_ref.append(a_t.reshape(1, a_dim))
        kld_ref = kld_ref + kl_t
    dec_ref = jnp.concatenate(dec_ref, axis=0)
    a_ref = jnp.concatenate(a_ref, axis=0)

    assert jnp.allclose(dec, dec_ref, atol=1e-3, rtol=1e-3), "dec mismatch"
    assert jnp.allclose(a, a_ref, atol=1e-3, rtol=1e-3), "a mismatch"
    assert jnp.allclose(h_fin, h_ref, atol=1e-3, rtol=1e-3), "h mismatch"
    assert jnp.allclose(kld, kld_ref, atol=2e-2, rtol=2e-2), "kld mismatch"

    print("KERNEL_OK")
</pallas_src>

<mosaic_0001>
module attributes {stable_mosaic.version = 11 : i64} {
  func.func @kernel(%arg0: i32, %arg1: memref<1x8x128xf32, #tpu.memory_space<vmem>>, %arg2: memref<8x128xf32, #tpu.memory_space<vmem>>, %arg3: memref<400x128xbf16, #tpu.memory_space<vmem>>, %arg4: memref<1x8x128xf32, #tpu.memory_space<vmem>>, %arg5: memref<8x128xf32, #tpu.memory_space<vmem>>) attributes {dimension_semantics = [#tpu.dimension_semantics<arbitrary>], iteration_bounds = array<i64: 8>, scalar_prefetch = 0 : i64, scratch_operands = 1 : i64, tpu.core_type = #tpu.core_type<tc>, window_params = [{transform_indices = @transform_0, window_bounds = array<i64: 1, 8, 128>}, {pipeline_mode = #tpu.pipeline_mode<synchronous>, transform_indices = @transform_1, window_bounds = array<i64: 8, 128>}, {pipeline_mode = #tpu.pipeline_mode<synchronous>, transform_indices = @transform_2, window_bounds = array<i64: 400, 128>}, {transform_indices = @transform_3, window_bounds = array<i64: 1, 8, 128>}]} {
    %c0_i32 = arith.constant 0 : i32
    %0 = arith.cmpi eq, %arg0, %c0_i32 : i32
    %1 = arith.extui %0 : i1 to i32
    %c0_i32_0 = arith.constant 0 : i32
    %2 = arith.cmpi ne, %1, %c0_i32_0 : i32
    scf.if %2 {
      %c0_106 = arith.constant 0 : index
      %c0_107 = arith.constant 0 : index
      %217 = vector.load %arg2[%c0_106, %c0_107] : memref<8x128xf32, #tpu.memory_space<vmem>>, vector<8x128xf32>
      %c0_108 = arith.constant 0 : index
      %c0_109 = arith.constant 0 : index
      %218 = vector.load %arg5[%c0_108, %c0_109] : memref<8x128xf32, #tpu.memory_space<vmem>>, vector<8x128xf32>
      tpu.vector_store %arg5[%c0_108, %c0_109], %217 {strides = array<i32>} : memref<8x128xf32, #tpu.memory_space<vmem>>, vector<8x128xf32>,
    } else {
    }
    %c0 = arith.constant 0 : index
    %c0_1 = arith.constant 0 : index
    %c0_2 = arith.constant 0 : index
    %3 = vector.load %arg1[%c0, %c0_1, %c0_2] : memref<1x8x128xf32, #tpu.memory_space<vmem>>, vector<1x1x16xf32>
    %4 = vector.shape_cast %3 : vector<1x1x16xf32> to vector<1x16xf32>
    %c0_3 = arith.constant 0 : index
    %c1 = arith.constant 1 : index
    %c0_4 = arith.constant 0 : index
    %5 = vector.load %arg1[%c0_3, %c1, %c0_4] : memref<1x8x128xf32, #tpu.memory_space<vmem>>, vector<1x1x8xf32>
    %6 = vector.shape_cast %5 : vector<1x1x8xf32> to vector<1x8xf32>
    %c0_5 = arith.constant 0 : index
    %c2 = arith.constant 2 : index
    %c0_6 = arith.constant 0 : index
    %7 = vector.load %arg1[%c0_5, %c2, %c0_6] : memref<1x8x128xf32, #tpu.memory_space<vmem>>, vector<1x1x16xf32>
    %8 = vector.shape_cast %7 : vector<1x1x16xf32> to vector<1x16xf32>
    %c1_7 = arith.constant 1 : index
    %c0_8 = arith.constant 0 : index
    %9 = vector.load %arg5[%c1_7, %c0_8] : memref<8x128xf32, #tpu.memory_space<vmem>>, vector<1x32xf32>
    %c160 = arith.constant 160 : index
    %c0_9 = arith.constant 0 : index
    %10 = vector.load %arg3[%c160, %c0_9] : memref<400x128xbf16, #tpu.memory_space<vmem>>, vector<16x32xbf16>
    %11 = arith.extf %10 : vector<16x32xbf16> to vector<16x32xf32>
    %cst = arith.constant dense<0.000000e+00> : vector<1x32xf32>
    %12 = tpu.matmul %4, %11, %cst {dimension_numbers = #tpu.dot_dimension_numbers<[1], [0], [0], [1], [0, 0, 1, 1], [], []>} : vector<1x16xf32>, vector<16x32xf32>, vector<1x32xf32> -> vector<1x32xf32>
    %c176 = arith.constant 176 : index
    %c0_10 = arith.constant 0 : index
    %13 = vector.load %arg3[%c176, %c0_10] : memref<400x128xbf16, #tpu.memory_space<vmem>>, vector<1x32xbf16>
    %14 = arith.extf %13 : vector<1x32xbf16> to vector<1x32xf32>
    %15 = arith.addf %12, %14 : vector<1x32xf32>
    %cst_11 = arith.constant 0.000000e+00 : f32
    %16 = vector.broadcast %cst_11 : f32 to vector<1x32xf32>
    %17 = arith.maximumf %15, %16 : vector<1x32xf32>
    %c192 = arith.constant 192 : index
    %c0_12 = arith.constant 0 : index
    %18 = vector.load %arg3[%c192, %c0_12] : memref<400x128xbf16, #tpu.memory_space<vmem>>, vector<32x32xbf16>
    %19 = arith.extf %18 : vector<32x32xbf16> to vector<32x32xf32>
    %cst_13 = arith.constant dense<0.000000e+00> : vector<1x32xf32>
    %20 = tpu.matmul %17, %19, %cst_13 {dimension_numbers = #tpu.dot_dimension_numbers<[1], [0], [0], [1], [0, 0, 1, 1], [], []>} : vector<1x32xf32>, vector<32x32xf32>, vector<1x32xf32> -> vector<1x32xf32>
    %c224 = arith.constant 224 : index
    %c0_14 = arith.constant 0 : index
    %21 = vector.load %arg3[%c224, %c0_14] : memref<400x128xbf16, #tpu.memory_space<vmem>>, vector<1x32xbf16>
    %22 = arith.extf %21 : vector<1x32xbf16> to vector<1x32xf32>
    %23 = arith.addf %20, %22 : vector<1x32xf32>
    %cst_15 = arith.constant 0.000000e+00 : f32
    %24 = vector.broadcast %cst_15 : f32 to vector<1x32xf32>
    %25 = arith.maximumf %23, %24 : vector<1x32xf32>
    %26 = tpu.concatenate %25, %9, %6 in 1 : vector<1x32xf32>, vector<1x32xf32>, vector<1x8xf32> -> vector<1x72xf32>
    %c0_16 = arith.constant 0 : index
    %c0_17 = arith.constant 0 : index
    %27 = vector.load %arg3[%c0_16, %c0_17] : memref<400x128xbf16, #tpu.memory_space<vmem>>, vector<72x64xbf16>
    %28 = arith.extf %27 : vector<72x64xbf16> to vector<72x64xf32>
    %cst_18 = arith.constant dense<0.000000e+00> : vector<1x64xf32>
    %29 = tpu.matmul %26, %28, %cst_18 {dimension_numbers = #tpu.dot_dimension_numbers<[1], [0], [0], [1], [0, 0, 1, 1], [], []>} : vector<1x72xf32>, vector<72x64xf32>, vector<1x64xf32> -> vector<1x64xf32>
    %c72 = arith.constant 72 : index
    %c0_19 = arith.constant 0 : index
    %30 = vector.load %arg3[%c72, %c0_19] : memref<400x128xbf16, #tpu.memory_space<vmem>>, vector<1x64xbf16>
    %31 = arith.extf %30 : vector<1x64xbf16> to vector<1x64xf32>
    %32 = arith.addf %29, %31 : vector<1x64xf32>
    %cst_20 = arith.constant 0.000000e+00 : f32
    %33 = vector.broadcast %cst_20 : f32 to vector<1x64xf32>
    %34 = arith.maximumf %32, %33 : vector<1x64xf32>
    %c80 = arith.constant 80 : index
    %c0_21 = arith.constant 0 : index
    %35 = vector.load %arg3[%c80, %c0_21] : memref<400x128xbf16, #tpu.memory_space<vmem>>, vector<64x64xbf16>
    %36 = arith.extf %35 : vector<64x64xbf16> to vector<64x64xf32>
    %cst_22 = arith.constant dense<0.000000e+00> : vector<1x64xf32>
    %37 = tpu.matmul %34, %36, %cst_22 {dimension_numbers = #tpu.dot_dimension_numbers<[1], [0], [0], [1], [0, 0, 1, 1], [], []>} : vector<1x64xf32>, vector<64x64xf32>, vector<1x64xf32> -> vector<1x64xf32>
    %c144 = arith.constant 144 : index
    %c0_23 = arith.constant 0 : index
    %38 = vector.load %arg3[%c144, %c0_23] : memref<400x128xbf16, #tpu.memory_space<vmem>>, vector<1x64xbf16>
    %39 = arith.extf %38 : vector<1x64xbf16> to vector<1x64xf32>
    %40 = arith.addf %37, %39 : vector<1x64xf32>
    %41 = vector.extract_strided_slice %40 {offsets = [0, 0], sizes = [1, 32], strides = [1, 1]} : vector<1x64xf32> to vector<1x32xf32>
    %cst_24 = arith.constant 0.000000e+00 : f32
    %42 = vector.broadcast %cst_24 : f32 to vector<1x32xf32>
    %43 = arith.maximumf %41, %42 : vector<1x32xf32>
    %44 = vector.extract_strided_slice %40 {offsets = [0, 32], sizes = [1, 16], strides = [1, 1]} : vector<1x64xf32> to vector<1x16xf32>
    %45 = vector.extract_strided_slice %40 {offsets = [0, 48], sizes = [1, 16], strides = [1, 1]} : vector<1x64xf32> to vector<1x16xf32>
    %cst_25 = arith.constant 0.000000e+00 : f32
    %46 = vector.broadcast %cst_25 : f32 to vector<1x16xf32>
    %47 = arith.maximumf %45, %46 : vector<1x16xf32>
    %48 = math.absf %45 : vector<1x16xf32>
    %cst_26 = arith.constant 0.000000e+00 : f32
    %49 = vector.broadcast %cst_26 : f32 to vector<1x16xf32>
    %50 = arith.subf %49, %48 : vector<1x16xf32>
    %51 = math.exp %50 : vector<1x16xf32>
    %52 = math.log1p %51 : vector<1x16xf32>
    %53 = arith.addf %47, %52 : vector<1x16xf32>
    %c192_27 = arith.constant 192 : index
    %c32 = arith.constant 32 : index
    %54 = vector.load %arg3[%c192_27, %c32] : memref<400x128xbf16, #tpu.memory_space<vmem>>, vector<32x32xbf16>
    %55 = arith.extf %54 : vector<32x32xbf16> to vector<32x32xf32>
    %cst_28 = arith.constant dense<0.000000e+00> : vector<1x32xf32>
    %56 = tpu.matmul %43, %55, %cst_28 {dimension_numbers = #tpu.dot_dimension_numbers<[1], [0], [0], [1], [0, 0, 1, 1], [], []>} : vector<1x32xf32>, vector<32x32xf32>, vector<1x32xf32> -> vector<1x32xf32>
    %c224_29 = arith.constant 224 : index
    %c32_30 = arith.constant 32 : index
    %57 = vector.load %arg3[%c224_29, %c32_30] : memref<400x128xbf16, #tpu.memory_space<vmem>>, vector<1x32xbf16>
    %58 = arith.extf %57 : vector<1x32xbf16> to vector<1x32xf32>
    %59 = arith.addf %56, %58 : vector<1x32xf32>
    %60 = vector.extract_strided_slice %59 {offsets = [0, 0], sizes = [1, 16], strides = [1, 1]} : vector<1x32xf32> to vector<1x16xf32>
    %61 = vector.extract_strided_slice %59 {offsets = [0, 16], sizes = [1, 16], strides = [1, 1]} : vector<1x32xf32> to vector<1x16xf32>
    %cst_31 = arith.constant 0.000000e+00 : f32
    %62 = vector.broadcast %cst_31 : f32 to vector<1x16xf32>
    %63 = arith.maximumf %61, %62 : vector<1x16xf32>
    %64 = math.absf %61 : vector<1x16xf32>
    %cst_32 = arith.constant 0.000000e+00 : f32
    %65 = vector.broadcast %cst_32 : f32 to vector<1x16xf32>
    %66 = arith.subf %65, %64 : vector<1x16xf32>
    %67 = math.exp %66 : vector<1x16xf32>
    %68 = math.log1p %67 : vector<1x16xf32>
    %69 = arith.addf %63, %68 : vector<1x16xf32>
    %70 = arith.mulf %8, %69 : vector<1x16xf32>
    %71 = arith.addf %70, %60 : vector<1x16xf32>
    %c160_33 = arith.constant 160 : index
    %c32_34 = arith.constant 32 : index
    %72 = vector.load %arg3[%c160_33, %c32_34] : memref<400x128xbf16, #tpu.memory_space<vmem>>, vector<16x32xbf16>
    %73 = arith.extf %72 : vector<16x32xbf16> to vector<16x32xf32>
    %cst_35 = arith.constant dense<0.000000e+00> : vector<1x32xf32>
    %74 = tpu.matmul %71, %73, %cst_35 {dimension_numbers = #tpu.dot_dimension_numbers<[1], [0], [0], [1], [0, 0, 1, 1], [], []>} : vector<1x16xf32>, vector<16x32xf32>, vector<1x32xf32> -> vector<1x32xf32>
    %c176_36 = arith.constant 176 : index
    %c32_37 = arith.constant 32 : index
    %75 = vector.load %arg3[%c176_36, %c32_37] : memref<400x128xbf16, #tpu.memory_space<vmem>>, vector<1x32xbf16>
    %76 = arith.extf %75 : vector<1x32xbf16> to vector<1x32xf32>
    %77 = arith.addf %74, %76 : vector<1x32xf32>
    %cst_38 = arith.constant 0.000000e+00 : f32
    %78 = vector.broadcast %cst_38 : f32 to vector<1x32xf32>
    %79 = arith.maximumf %77, %78 : vector<1x32xf32>
    %80 = tpu.concatenate %79, %9, %6 in 1 : vector<1x32xf32>, vector<1x32xf32>, vector<1x8xf32> -> vector<1x72xf32>
    %c0_39 = arith.constant 0 : index
    %c64 = arith.constant 64 : index
    %81 = vector.load %arg3[%c0_39, %c64] : memref<400x128xbf16, #tpu.memory_space<vmem>>, vector<72x32xbf16>
    %82 = arith.extf %81 : vector<72x32xbf16> to vector<72x32xf32>
    %cst_40 = arith.constant dense<0.000000e+00> : vector<1x32xf32>
    %83 = tpu.matmul %80, %82, %cst_40 {dimension_numbers = #tpu.dot_dimension_numbers<[1], [0], [0], [1], [0, 0, 1, 1], [], []>} : vector<1x72xf32>, vector<72x32xf32>, vector<1x32xf32> -> vector<1x32xf32>
    %c72_41 = arith.constant 72 : index
    %c64_42 = arith.constant 64 : index
    %84 = vector.load %arg3[%c72_41, %c64_42] : memref<400x128xbf16, #tpu.memory_space<vmem>>, vector<1x32xbf16>
    %85 = arith.extf %84 : vector<1x32xbf16> to vector<1x32xf32>
    %86 = arith.addf %83, %85 : vector<1x32xf32>
    %cst_43 = arith.constant 0.000000e+00 : f32
    %87 = vector.broadcast %cst_43 : f32 to vector<1x32xf32>
    %88 = arith.maximumf %86, %87 : vector<1x32xf32>
    %c192_44 = arith.constant 192 : index
    %c64_45 = arith.constant 64 : index
    %89 = vector.load %arg3[%c192_44, %c64_45] : memref<400x128xbf16, #tpu.memory_space<vmem>>, vector<32x32xbf16>
    %90 = arith.extf %89 : vector<32x32xbf16> to vector<32x32xf32>
    %cst_46 = arith.constant dense<0.000000e+00> : vector<1x32xf32>
    %91 = tpu.matmul %88, %90, %cst_46 {dimension_numbers = #tpu.dot_dimension_numbers<[1], [0], [0], [1], [0, 0, 1, 1], [], []>} : vector<1x32xf32>, vector<32x32xf32>, vector<1x32xf32> -> vector<1x32xf32>
    %c224_47 = arith.constant 224 : index
    %c64_48 = arith.constant 64 : index
    %92 = vector.load %arg3[%c224_47, %c64_48] : memref<400x128xbf16, #tpu.memory_space<vmem>>, vector<1x32xbf16>
    %93 = arith.extf %92 : vector<1x32xbf16> to vector<1x32xf32>
    %94 = arith.addf %91, %93 : vector<1x32xf32>
    %cst_49 = arith.constant 0.000000e+00 : f32
    %95 = vector.broadcast %cst_49 : f32 to vector<1x32xf32>
    %96 = arith.maximumf %94, %95 : vector<1x32xf32>
    %c192_50 = arith.constant 192 : index
    %c96 = arith.constant 96 : index
    %97 = vector.load %arg3[%c192_50, %c96] : memref<400x128xbf16, #tpu.memory_space<vmem>>, vector<32x16xbf16>
    %98 = arith.extf %97 : vector<32x16xbf16> to vector<32x16xf32>
    %cst_51 = arith.constant dense<0.000000e+00> : vector<1x16xf32>
    %99 = tpu.matmul %96, %98, %cst_51 {dimension_numbers = #tpu.dot_dimension_numbers<[1], [0], [0], [1], [0, 0, 1, 1], [], []>} : vector<1x32xf32>, vector<32x16xf32>, vector<1x16xf32> -> vector<1x16xf32>
    %c224_52 = arith.constant 224 : index
    %c96_53 = arith.constant 96 : index
    %100 = vector.load %arg3[%c224_52, %c96_53] : memref<400x128xbf16, #tpu.memory_space<vmem>>, vector<1x16xbf16>
    %101 = arith.extf %100 : vector<1x16xbf16> to vector<1x16xf32>
    %102 = arith.addf %99, %101 : vector<1x16xf32>
    %103 = tpu.concatenate %25, %79 in 1 : vector<1x32xf32>, vector<1x32xf32> -> vector<1x64xf32>
    %c0_54 = arith.constant 0 : index
    %c0_55 = arith.constant 0 : index
    %104 = vector.load %arg5[%c0_54, %c0_55] : memref<8x128xf32, #tpu.memory_space<vmem>>, vector<1x32xf32>
    %105 = tpu.concatenate %103, %104 in 1 : vector<1x64xf32>, vector<1x32xf32> -> vector<1x96xf32>
    %c240 = arith.constant 240 : index
    %c0_56 = arith.constant 0 : index
    %106 = vector.load %arg3[%c240, %c0_56] : memref<400x128xbf16, #tpu.memory_space<vmem>>, vector<96x128xbf16>
    %107 = arith.extf %106 : vector<96x128xbf16> to vector<96x128xf32>
    %cst_57 = arith.constant dense<0.000000e+00> : vector<1x128xf32>
    %108 = tpu.matmul %105, %107, %cst_57 {dimension_numbers = #tpu.dot_dimension_numbers<[1], [0], [0], [1], [0, 0, 1, 1], [], []>} : vector<1x96xf32>, vector<96x128xf32>, vector<1x128xf32> -> vector<1x128xf32>
    %109 = vector.extract_strided_slice %108 {offsets = [0, 0], sizes = [1, 32], strides = [1, 1]} : vector<1x128xf32> to vector<1x32xf32>
    %cst_58 = arith.constant 5.000000e-01 : f32
    %110 = vector.broadcast %cst_58 : f32 to vector<1x32xf32>
    %111 = arith.mulf %110, %109 : vector<1x32xf32>
    %112 = math.tanh %111 : vector<1x32xf32>
    %cst_59 = arith.constant 5.000000e-01 : f32
    %113 = vector.broadcast %cst_59 : f32 to vector<1x32xf32>
    %114 = arith.mulf %113, %112 : vector<1x32xf32>
    %cst_60 = arith.constant 5.000000e-01 : f32
    %115 = vector.broadcast %cst_60 : f32 to vector<1x32xf32>
    %116 = arith.addf %114, %115 : vector<1x32xf32>
    %117 = vector.extract_strided_slice %108 {offsets = [0, 32], sizes = [1, 32], strides = [1, 1]} : vector<1x128xf32> to vector<1x32xf32>
    %cst_61 = arith.constant 5.000000e-01 : f32
    %118 = vector.broadcast %cst_61 : f32 to vector<1x32xf32>
    %119 = arith.mulf %118, %117 : vector<1x32xf32>
    %120 = math.tanh %119 : vector<1x32xf32>
    %cst_62 = arith.constant 5.000000e-01 : f32
    %121 = vector.broadcast %cst_62 : f32 to vector<1x32xf32>
    %122 = arith.mulf %121, %120 : vector<1x32xf32>
    %cst_63 = arith.constant 5.000000e-01 : f32
    %123 = vector.broadcast %cst_63 : f32 to vector<1x32xf32>
    %124 = arith.addf %122, %123 : vector<1x32xf32>
    %125 = vector.extract_strided_slice %108 {offsets = [0, 64], sizes = [1, 32], strides = [1, 1]} : vector<1x128xf32> to vector<1x32xf32>
    %126 = vector.extract_strided_slice %108 {offsets = [0, 96], sizes = [1, 32], strides = [1, 1]} : vector<1x128xf32> to vector<1x32xf32>
    %127 = arith.mulf %116, %126 : vector<1x32xf32>
    %128 = arith.addf %125, %127 : vector<1x32xf32>
    %129 = math.tanh %128 : vector<1x32xf32>
    %cst_64 = arith.constant 1.000000e+00 : f32
    %130 = vector.broadcast %cst_64 : f32 to vector<1x32xf32>
    %131 = arith.subf %130, %124 : vector<1x32xf32>
    %132 = arith.mulf %131, %129 : vector<1x32xf32>
    %133 = arith.mulf %124, %104 : vector<1x32xf32>
    %134 = arith.addf %132, %133 : vector<1x32xf32>
    %c1_65 = arith.constant 1 : index
    %c0_66 = arith.constant 0 : index
    %135 = vector.load %arg5[%c1_65, %c0_66] : memref<8x128xf32, #tpu.memory_space<vmem>>, vector<1x32xf32>
    %136 = tpu.concatenate %134, %135 in 1 : vector<1x32xf32>, vector<1x32xf32> -> vector<1x64xf32>
    %c336 = arith.constant 336 : index
    %c0_67 = arith.constant 0 : index
    %137 = vector.load %arg3[%c336, %c0_67] : memref<400x128xbf16, #tpu.memory_space<vmem>>, vector<64x128xbf16>
    %138 = arith.extf %137 : vector<64x128xbf16> to vector<64x128xf32>
    %cst_68 = arith.constant dense<0.000000e+00> : vector<1x128xf32>
    %139 = tpu.matmul %136, %138, %cst_68 {dimension_numbers = #tpu.dot_dimension_numbers<[1], [0], [0], [1], [0, 0, 1, 1], [], []>} : vector<1x64xf32>, vector<64x128xf32>, vector<1x128xf32> -> vector<1x128xf32>
    %140 = vector.extract_strided_slice %139 {offsets = [0, 0], sizes = [1, 32], strides = [1, 1]} : vector<1x128xf32> to vector<1x32xf32>
    %cst_69 = arith.constant 5.000000e-01 : f32
    %141 = vector.broadcast %cst_69 : f32 to vector<1x32xf32>
    %142 = arith.mulf %141, %140 : vector<1x32xf32>
    %143 = math.tanh %142 : vector<1x32xf32>
    %cst_70 = arith.constant 5.000000e-01 : f32
    %144 = vector.broadcast %cst_70 : f32 to vector<1x32xf32>
    %145 = arith.mulf %144, %143 : vector<1x32xf32>
    %cst_71 = arith.constant 5.000000e-01 : f32
    %146 = vector.broadcast %cst_71 : f32 to vector<1x32xf32>
    %147 = arith.addf %145, %146 : vector<1x32xf32>
    %148 = vector.extract_strided_slice %139 {offsets = [0, 32], sizes = [1, 32], strides = [1, 1]} : vector<1x128xf32> to vector<1x32xf32>
    %cst_72 = arith.constant 5.000000e-01 : f32
    %149 = vector.broadcast %cst_72 : f32 to vector<1x32xf32>
    %150 = arith.mulf %149, %148 : vector<1x32xf32>
    %151 = math.tanh %150 : vector<1x32xf32>
    %cst_73 = arith.constant 5.000000e-01 : f32
    %152 = vector.broadcast %cst_73 : f32 to vector<1x32xf32>
    %153 = arith.mulf %152, %151 : vector<1x32xf32>
    %cst_74 = arith.constant 5.000000e-01 : f32
    %154 = vector.broadcast %cst_74 : f32 to vector<1x32xf32>
    %155 = arith.addf %153, %154 : vector<1x32xf32>
    %156 = vector.extract_strided_slice %139 {offsets = [0, 64], sizes = [1, 32], strides = [1, 1]} : vector<1x128xf32> to vector<1x32xf32>
    %157 = vector.extract_strided_slice %139 {offsets = [0, 96], sizes = [1, 32], strides = [1, 1]} : vector<1x128xf32> to vector<1x32xf32>
    %158 = arith.mulf %147, %157 : vector<1x32xf32>
    %159 = arith.addf %156, %158 : vector<1x32xf32>
    %160 = math.tanh %159 : vector<1x32xf32>
    %cst_75 = arith.constant 1.000000e+00 : f32
    %161 = vector.broadcast %cst_75 : f32 to vector<1x32xf32>
    %162 = arith.subf %161, %155 : vector<1x32xf32>
    %163 = arith.mulf %162, %160 : vector<1x32xf32>
    %164 = arith.mulf %155, %135 : vector<1x32xf32>
    %165 = arith.addf %163, %164 : vector<1x32xf32>
    %c192_76 = arith.constant 192 : index
    %c112 = arith.constant 112 : index
    %166 = vector.load %arg3[%c192_76, %c112] : memref<400x128xbf16, #tpu.memory_space<vmem>>, vector<32x8xbf16>
    %167 = arith.extf %166 : vector<32x8xbf16> to vector<32x8xf32>
    %cst_77 = arith.constant dense<0.000000e+00> : vector<1x8xf32>
    %168 = tpu.matmul %165, %167, %cst_77 {dimension_numbers = #tpu.dot_dimension_numbers<[1], [0], [0], [1], [0, 0, 1, 1], [], []>} : vector<1x32xf32>, vector<32x8xf32>, vector<1x8xf32> -> vector<1x8xf32>
    %c224_78 = arith.constant 224 : index
    %c112_79 = arith.constant 112 : index
    %169 = vector.load %arg3[%c224_78, %c112_79] : memref<400x128xbf16, #tpu.memory_space<vmem>>, vector<1x8xbf16>
    %170 = arith.extf %169 : vector<1x8xbf16> to vector<1x8xf32>
    %171 = arith.addf %168, %170 : vector<1x8xf32>
    %172 = math.tanh %171 : vector<1x8xf32>
    %173 = arith.mulf %53, %53 : vector<1x16xf32>
    %174 = tpu.reciprocal %173 {approx = true} : vector<1x16xf32> -> vector<1x16xf32>
    %175 = math.log %53 : vector<1x16xf32>
    %cst_80 = arith.constant 2.000000e+00 : f32
    %176 = vector.broadcast %cst_80 : f32 to vector<1x16xf32>
    %177 = arith.mulf %176, %175 : vector<1x16xf32>
    %178 = math.log %69 : vector<1x16xf32>
    %cst_81 = arith.constant 2.000000e+00 : f32
    %179 = vector.broadcast %cst_81 : f32 to vector<1x16xf32>
    %180 = arith.mulf %179, %178 : vector<1x16xf32>
    %181 = arith.subf %177, %180 : vector<1x16xf32>
    %182 = arith.mulf %69, %69 : vector<1x16xf32>
    %183 = arith.subf %60, %44 : vector<1x16xf32>
    %184 = arith.mulf %183, %183 : vector<1x16xf32>
    %185 = arith.addf %182, %184 : vector<1x16xf32>
    %186 = arith.mulf %185, %174 : vector<1x16xf32>
    %187 = arith.addf %181, %186 : vector<1x16xf32>
    %cst_82 = arith.constant 1.000000e+00 : f32
    %188 = vector.broadcast %cst_82 : f32 to vector<1x16xf32>
    %189 = arith.subf %187, %188 : vector<1x16xf32>
    %190 = vector.shape_cast %189 : vector<1x16xf32> to vector<1x1x16xf32>
    %cst_83 = arith.constant dense<0.000000e+00> : vector<1xf32>
    %191 = vector.multi_reduction <add>, %190, %cst_83 [1, 2] : vector<1x1x16xf32> to vector<1xf32>
    %192 = vector.shape_cast %191 : vector<1xf32> to vector<1x1x1xf32>
    %193 = vector.extract %192[0, 0, 0] : f32 from vector<1x1x1xf32>
    %cst_84 = arith.constant 5.000000e-01 : f32
    %194 = arith.mulf %cst_84, %193 : f32
    %c0_85 = arith.constant 0 : index
    %c0_86 = arith.constant 0 : index
    %195 = vector.load %arg5[%c0_85, %c0_86] : memref<8x128xf32, #tpu.memory_space<vmem>>, vector<1x32xf32>
    tpu.vector_store %arg5[%c0_85, %c0_86], %134 {strides = array<i32>} : memref<8x128xf32, #tpu.memory_space<vmem>>, vector<1x32xf32>,
    %c1_87 = arith.constant 1 : index
    %c0_88 = arith.constant 0 : index
    %196 = vector.load %arg5[%c1_87, %c0_88] : memref<8x128xf32, #tpu.memory_space<vmem>>, vector<1x32xf32>
    tpu.vector_store %arg5[%c1_87, %c0_88], %165 {strides = array<i32>} : memref<8x128xf32, #tpu.memory_space<vmem>>, vector<1x32xf32>,
    %cst_89 = arith.constant 0.000000e+00 : f32
    %197 = vector.broadcast %cst_89 : f32 to vector<8x128xf32>
    %c0_90 = arith.constant 0 : index
    %c0_91 = arith.constant 0 : index
    %c0_92 = arith.constant 0 : index
    %198 = vector.load %arg4[%c0_90, %c0_91, %c0_92] : memref<1x8x128xf32, #tpu.memory_space<vmem>>, vector<1x8x128xf32>
    %199 = vector.shape_cast %198 : vector<1x8x128xf32> to vector<8x128xf32>
    %200 = vector.shape_cast %197 : vector<8x128xf32> to vector<1x8x128xf32>
    tpu.vector_store %arg4[%c0_90, %c0_91, %c0_92], %200 {strides = array<i32>} : memref<1x8x128xf32, #tpu.memory_space<vmem>>, vector<1x8x128xf32>,
    %c0_93 = arith.constant 0 : index
    %c0_94 = arith.constant 0 : index
    %c0_95 = arith.constant 0 : index
    %201 = vector.load %arg4[%c0_93, %c0_94, %c0_95] : memref<1x8x128xf32, #tpu.memory_space<vmem>>, vector<1x1x16xf32>
    %202 = vector.shape_cast %201 : vector<1x1x16xf32> to vector<1x16xf32>
    %203 = vector.shape_cast %102 : vector<1x16xf32> to vector<1x1x16xf32>
    tpu.vector_store %arg4[%c0_93, %c0_94, %c0_95], %203 {strides = array<i32>} : memref<1x8x128xf32, #tpu.memory_space<vmem>>, vector<1x1x16xf32>,
    %c0_96 = arith.constant 0 : index
    %c0_97 = arith.constant 0 : index
    %c16 = arith.constant 16 : index
    %204 = vector.load %arg4[%c0_96, %c0_97, %c16] : memref<1x8x128xf32, #tpu.memory_space<vmem>>, vector<1x1x8xf32>
    %205 = vector.shape_cast %204 : vector<1x1x8xf32> to vector<1x8xf32>
    %206 = vector.shape_cast %172 : vector<1x8xf32> to vector<1x1x8xf32>
    tpu.vector_store %arg4[%c0_96, %c0_97, %c16], %206 {strides = array<i32>} : memref<1x8x128xf32, #tpu.memory_space<vmem>>, vector<1x1x8xf32>,
    %207 = vector.broadcast %194 : f32 to vector<1x1xf32>
    %c0_98 = arith.constant 0 : index
    %c0_99 = arith.constant 0 : index
    %c24 = arith.constant 24 : index
    %208 = vector.load %arg4[%c0_98, %c0_99, %c24] : memref<1x8x128xf32, #tpu.memory_space<vmem>>, vector<1x1x1xf32>
    %209 = vector.shape_cast %208 : vector<1x1x1xf32> to vector<1x1xf32>
    %210 = vector.shape_cast %207 : vector<1x1xf32> to vector<1x1x1xf32>
    tpu.vector_store %arg4[%c0_98, %c0_99, %c24], %210 {strides = array<i32>} : memref<1x8x128xf32, #tpu.memory_space<vmem>>, vector<1x1x1xf32>,
    %c0_100 = arith.constant 0 : index
    %c1_101 = arith.constant 1 : index
    %c0_102 = arith.constant 0 : index
    %211 = vector.load %arg4[%c0_100, %c1_101, %c0_102] : memref<1x8x128xf32, #tpu.memory_space<vmem>>, vector<1x1x32xf32>
    %212 = vector.shape_cast %211 : vector<1x1x32xf32> to vector<1x32xf32>
    %213 = vector.shape_cast %134 : vector<1x32xf32> to vector<1x1x32xf32>
    tpu.vector_store %arg4[%c0_100, %c1_101, %c0_102], %213 {strides = array<i32>} : memref<1x8x128xf32, #tpu.memory_space<vmem>>, vector<1x1x32xf32>,
    %c0_103 = arith.constant 0 : index
    %c2_104 = arith.constant 2 : index
    %c0_105 = arith.constant 0 : index
    %214 = vector.load %arg4[%c0_103, %c2_104, %c0_105] : memref<1x8x128xf32, #tpu.memory_space<vmem>>, vector<1x1x32xf32>
    %215 = vector.shape_cast %214 : vector<1x1x32xf32> to vector<1x32xf32>
    %216 = vector.shape_cast %165 : vector<1x32xf32> to vector<1x1x32xf32>
    tpu.vector_store %arg4[%c0_103, %c2_104, %c0_105], %216 {strides = array<i32>} : memref<1x8x128xf32, #tpu.memory_space<vmem>>, vector<1x1x32xf32>,
    return
  }
  func.func @transform_0(%arg0: i32) -> (i32, i32, i32) {
    %c0_i32 = arith.constant 0 : i32
    %c0_i32_0 = arith.constant 0 : i32
    %c0_i32_1 = arith.constant 0 : i32
    return %arg0, %c0_i32, %c0_i32_0 : i32, i32, i32
  }
  func.func @transform_1(%arg0: i32) -> (i32, i32) {
    %c0_i32 = arith.constant 0 : i32
    %c0_i32_0 = arith.constant 0 : i32
    %c0_i32_1 = arith.constant 0 : i32
    return %c0_i32, %c0_i32_0 : i32, i32
  }
  func.func @transform_2(%arg0: i32) -> (i32, i32) {
    %c0_i32 = arith.constant 0 : i32
    %c0_i32_0 = arith.constant 0 : i32
    %c0_i32_1 = arith.constant 0 : i32
    return %c0_i32, %c0_i32_0 : i32, i32
  }
  func.func @transform_3(%arg0: i32) -> (i32, i32, i32) {
    %c0_i32 = arith.constant 0 : i32
    %c0_i32_0 = arith.constant 0 : i32
    %c0_i32_1 = arith.constant 0 : i32
    return %arg0, %c0_i32, %c0_i32_0 : i32, i32, i32
  }
}

</mosaic_0001>

<bundles_post_ra>
// kernel: vrnn_rollout.1
= control target key start
LH: loop header
LB: loop body
LE: loop exit
PB: predicated region body
PF: predicated region fallthrough
CT: control target
= control target key end

     0   :  { %8 = vsyncpa [#allocation4], 0  ;;  %s2221_s12 = smov 0   ;;  %s2538_s0 = inlined_call_operand.vmem [shape: f32[8,8,128], index: 0, kind: input, shape index: {}]   ;;  %s2539_s1 = inlined_call_operand.vmem [shape: f32[8,128], index: 1, kind: input, shape index: {}]   ;;  %s2540_s2 = inlined_call_operand.hbm [shape: bf16[400,128], index: 2, kind: input, shape index: {}]   ;;  %s2541_s3 = inlined_call_operand.vmem [shape: f32[8,8,128], index: 3, kind: output, shape index: {}]  }
   0x1 LB: > { %s2227_s13 = sadd.s32 4294967295, %s2187_s12   ;;  %p1541_p0 = scmp.ge.s32.totalorder %s2187_s12, 1  ;;  %s2187_s12 = sphi %s2221_s12, %s14_s12  }
   0x2   : > { %p113_p1 = scmp.lt.s32.totalorder %s2187_s12, 9  ;;  %s2189_s14 = smov [#allocation3]  }
   0x3   : > { %s128_s15 = sshll.u32 %s2189_s14, 4  ;;  %p2542_p4 = scmp.eq.s32.totalorder %s2227_s13, 0  ;;  %s129_s15 = int_to_ptr.vmem [resolvable:$true] %s128_s15 }
   0x4   : > { %p2232_p3 = pnand %p1541_p0, %p113_p1  ;;  %s2149_s20 = scalar_lea.hbm %s2540_s2, 3200 }
   0x5   : > { %p2150_p7 = scmp.ne.s32.totalorder %s2540_s2, %s2149_s20  ;;  %p2156_p11 = scmp.lt.u32.totalorder %s2149_s20, %s2540_s2 }
   0x6   : > { %s2544_s16 = scalar_select %p2232_p3, 1, 0 }
   0x7   : > { %p2034_p5 = pneg %p2232_p3 }
   0x9   : > { %p2241_p6 = pnand %p2542_p4, %p2034_p5 }
   0xb   : > { %p2151_p8 = pneg %p2241_p6 }
   0xd   : > { %p2152_p9 = pnand %p2151_p8, %p2150_p7 }
   0xf   : > { %p2153_p10 = pneg %p2152_p9 }
  0x11   : > { %p2158_p12 = pnand %p2156_p11, %p2153_p10 }
  0x13   : > { %2161 = shalt.err (!%p2158_p12)
}
  0x14   : > { %s2162_s25 = scalar_lea.vmem %s129_s15, 3200  ;;  %p2170_p5 = scmp.lt.s32.totalorder %s129_s15, %s129_s15 }
  0x15   : > { %p2163_p13 = scmp.ne.s32.totalorder %s129_s15, %s2162_s25  ;;  %p2171_p2 = scmp.lt.s32.totalorder %s2162_s25, %s2162_s25 }
  0x17   : > { %p2165_p0 = pnand %p2163_p13, %p2151_p8  ;;  %p2172_p4 = por %p2171_p2, %p2170_p5 }
  0x19   : > { %p2166_p1 = pneg %p2165_p0 }
  0x1b   : > { %p2173_p3 = pnand %p2172_p4, %p2166_p1 }
  0x1d   : > { %2176 = shalt.err (!%p2173_p3)
}
  0x1e   : > { %s2190_s26 = smov 64   ;;  %s2191_s27 = smov 4  }
  0x1f   : > { %2037 = dma.hbm_to_vmem [thread:$0]  (!%p2241_p6), %s2540_s2, 3200, %s129_s15, [#allocation4], %s2190_s26, %s2190_s26, %s2191_s27  }
  0x20   : > { %p2546_p7 = scmp.ne.s32.totalorder %s2544_s16, 0 }
  0x21   : > { %p2547_p9 = scmp.eq.s32.totalorder (!%p2546_p7), %s2227_s13, 0 }
  0x22   : > { %151 = sbr.rel (%p2546_p7) target bundleno = 3797 (0xed5), region = 32 }
  0x29   : > { %2182 = dma.done.wait (%p2547_p9), [#allocation4], 3200   ;;  %p2548_p8 = pmov %p2547_p9 }
  0x2a   : > { %p173_p2 = scmp.lt.s32.totalorder %s2227_s13, 7  ;;  %p2549_p3 = scmp.ne.s32.totalorder %s2227_s13, 0 }
  0x2b   : > { %2184 = vsyncadd (%p2548_p8), [#allocation4], 4294964096  ;;  %v185_v0 = vld [vmem:[%s2539_s1] sm:$0xff] (!%p2549_p3) }
  0x2c   : > { %s174_s30 = scalar_select %p173_p2, %s2227_s13, 7 }
  0x2d   : > { %184 = sbr.rel (%p2549_p3) target bundleno = 52 (0x34), region = 40  ;;  %186 = vst [vmem:[#allocation2] sm:$0xff] (!%p2549_p3), %v185_v0 }
  0x2e   : > { %s1546_s4 = sshll.u32 %s174_s30, 3 }
  0x2f   : > { %s2272_s7 = scalar_lea.vmem %s2538_s0, %s1546_s4  ;;  %s2277_s10 = scalar_lea.vmem %s2541_s3, %s1546_s4 }
  0x34 PF: > { %v2284_v1 = vld [vmem:[#allocation3 + $0x50] sm:$0xff]   ;;  %v2192_v2 = vmov 0.0|0.0   ;;  %vm2193_vm0 = vmmov 0   ;;  %v2194_v3 = vmov 0.0   ;;  %v2291_v4 = vld [vmem:[#allocation3 + $0x60] sm:$0xff]   ;;  %vm197_vm1 = vcmask 130048  }
  0x35   : > { %1926 = vmatprep.subr.bf16.mxu0 %v2192_v2  ;;  %1754 = vmatprep.mubr.msk.f32.mxu0 %vm2193_vm0, %v2194_v3  ;;  %1461 = vst [vmem:[%s2277_s10] sm:$0xff] %v2194_v3  ;;  %v187_v5 = vld [vmem:[%s2272_s7] sm:$0x1]  ;;  %v2304_v6 = vld [vmem:[#allocation3 + $0x68] sm:$0xff]   ;;  %v190_v7 = vld [vmem:[#allocation2 + $0x1] sm:$0x1]  ;;  %s2195_s13 = smov 32   ;;  %v1570_v34 = vunpack.c.l.bf16 %v2291_v4  ;;  %v1571_v35 = vunpack.c.h.bf16 %v2291_v4  ;;  %v1566_v61 = vunpack.c.l.bf16 %v2284_v1  ;;  %v1567_v62 = vunpack.c.h.bf16 %v2284_v1 }
  0x36   : > { %1928 = vmatpush3.bf16.msra.mxu0 %v2284_v1  ;;  %1929 = vmatprep.subr.bf16.mxu1 %v2192_v2  ;;  %v2309_v8 = vld [vmem:[#allocation3] sm:$0xff]   ;;  %v188_v9 = vld [vmem:[%s2272_s7 + $0x1] sm:$0x1]  ;;  %v2314_v10 = vld [vmem:[#allocation3 + $0x8] sm:$0xff]   ;;  %s2196_s15 = smov 64   ;;  %vm282_vm2 = vcmask 261120   ;;  %v1574_v37 = vunpack.c.l.bf16 %v2304_v6  ;;  %v1575_v38 = vunpack.c.h.bf16 %v2304_v6 }
  0x37   : > { %1931 = vmatpush3.bf16.msra.mxu1 %v2291_v4  ;;  %1765 = vmatprep.mubr.msk.f32.mxu1 %vm2193_vm0, %v2194_v3  ;;  %v2319_v11 = vld [vmem:[#allocation3 + $0x10] sm:$0xff]   ;;  %v2323_v12 = vld [vmem:[#allocation3 + $0x58] sm:$0x1]  ;;  %v2335_v19 = vld [vmem:[#allocation3 + $0x20] sm:$0xf]  ;;  %vm366_vm3 = vcmask 523264   ;;  %v2368_v39 = vpack.i.bf16 %v1571_v35, %v1570_v34  ;;  %v2070_v63 = vpack.i.bf16 %v1567_v62, %v1566_v61 }
  0x38   : > { %1932 = vmatprep.subr.bf16.mxu1 %v2192_v2  ;;  %1935 = vmatprep.subr.bf16.mxu0 %v2192_v2  ;;  %v196_v13 = vunpack.c.l.bf16 %v2323_v12  ;;  %v2331_v18 = vld [vmem:[#allocation3 + $0x18] sm:$0xff]   ;;  %v385_v20 = vunpack.c.l.bf16 %v2335_v19  ;;  %v1654_v21 = vld [vmem:[#allocation3 + $0x28] sm:$0xff]   ;;  %v1655_v22 = vld [vmem:[#allocation3 + $0x30] sm:$0xff]   ;;  %vm388_vm4 = vcmask 588800   ;;  %s2197_s16 = smov 96   ;;  %v2374_v40 = vpack.i.bf16 %v1575_v38, %v1574_v37  ;;  %s2198_s17 = smov 112  }
  0x39   : > { %1755 = vmatmul.mubr.msk.f32.vlgmr.msra.gmra.mrb[0].mxu0 %vm197_vm1, %v187_v5  ;;  %358 = vrot.lane.b32.xlu0 %v190_v7, %s2195_s13  ;;  %v1656_v23 = vld [vmem:[#allocation3 + $0x38] sm:$0xff]   ;;  %v280_v24 = vld [vmem:[#allocation3 + $0x70] sm:$0x1]  ;;  %v1657_v36 = vld [vmem:[#allocation3 + $0x40] sm:$0xff]   ;;  %vm1097_vm6 = vcmask 785408   ;;  %vm1457_vm7 = vcmask 253952  }
  0x3a   : > { %1786 = vmatprep.mubr.msk.f32.mxu0 %vm2193_vm0, %v2194_v3  ;;  %1937 = vmatpush3.bf16.msra.mxu0 %v2309_v8  ;;  %v2344_v25 = vunpack.c.l.bf16 %v280_v24  ;;  %v2378_v42 = vld [vmem:[#allocation3 + $0x24] sm:$0x1]  ;;  %v479_v55 = vld [vmem:[#allocation3 + $0x48] sm:$0x1]  ;;  %v1579_v24 = vunpack.c.h.bf16 %v2309_v8  ;;  %s2199_s18 = smov 16   ;;  %s2200_s19 = smov 80  }
  0x3b   : > { %1934 = vmatpush3.bf16.msra.mxu1 %v2304_v6  ;;  %1938 = vmatprep.subr.bf16.mxu0 %v2192_v2  ;;  %v387_v46 = vunpack.c.l.bf16 %v2378_v42  ;;  %v480_v56 = vunpack.c.l.bf16 %v479_v55  ;;  %vm1445_vm9 = vcmask 122880   ;;  %vm1467_vm10 = vcmask 188544  }
  0x3c   : > { %1947 = vmatprep.subr.bf16.mxu1 %v2192_v2  ;;  %2061 = vrot.lane.b32.xlu1 %v2368_v39, %s2197_s16  ;;  %vm1470_vm11 = vcmask 196800  }
  0x3d   : > { %362 = vrot.lane.b32.xlu0 %v188_v9, %s2196_s15 }
  0x3e   : > { %1940 = vmatpush3.bf16.msra.mxu0 %v2314_v10 }
  0x3f   : > { %1941 = vmatprep.subr.bf16.mxu0 %v2192_v2 }
  0x40   : > { %2066 = vrot.lane.b32.xlu1 %v2374_v40, %s2197_s16 }
  0x41   : > { %586 = vrot.lane.b32.xlu0 %v2344_v25, %s2197_s16 }
  0x42   : > { %1943 = vmatpush3.bf16.msra.mxu0 %v2319_v11 }
  0x43   : > { %1944 = vmatprep.subr.bf16.mxu0 %v2192_v2 }
  0x44   : > { %2071 = vrot.lane.b32.xlu1 %v2070_v63, %s2197_s16 }
  0x46   : > { %1946 = vmatpush3.bf16.msra.mxu0 %v2331_v18 }
  0x47   : > { %1784 = vmatprep.subr.mxu0 %v2194_v3 }
  0x4a   : > { %1785 = vmatpush3.msra.mxu0 %v385_v20 }
  0x4b   : > { %1959 = vmatprep.subr.bf16.mxu0 %v2192_v2 }
  0xab   : > { %v2346_v26 = vpop.permute.xlu0 %358 }
  0xae   : > { %v2062_v41 = vpop.permute.xlu1 %2061 }
  0xaf   : > { %v2352_v31 = vpop.permute.xlu0 %362  ;;  %v2064_v43 = vunpack.i.h.bf16 %v2062_v41  ;;  %v2063_v44 = vunpack.i.l.bf16 %v2062_v41 }
  0xb1   : > { %v1960_v45 = vpack.c.bf16 %v2064_v43, %v2063_v44  ;;  %v1582_v43 = vunpack.c.l.bf16 %v2314_v10  ;;  %v1583_v44 = vunpack.c.h.bf16 %v2314_v10 }
  0xb2   : > { %v2067_v47 = vpop.permute.xlu1 %2066 }
  0xb3   : > { %v2069_v48 = vunpack.i.h.bf16 %v2067_v47  ;;  %v2068_v49 = vunpack.i.l.bf16 %v2067_v47  ;;  %v587_v4 = vpop.permute.xlu0 %586  ;;  %v1590_v47 = vunpack.c.l.bf16 %v2331_v18 }
  0xb5   : > { %v1963_v51 = vpack.c.bf16 %v2069_v48, %v2068_v49  ;;  %v1591_v48 = vunpack.c.h.bf16 %v2331_v18  ;;  %v2080_v49 = vpack.i.bf16 %v1583_v44, %v1582_v43 }
  0xb6   : > { %v2072_v0 = vpop.permute.xlu1 %2071 }
  0xb7   : > { %v2074_v5 = vunpack.i.h.bf16 %v2072_v0  ;;  %v2073_v6 = vunpack.i.l.bf16 %v2072_v0  ;;  %v2090_v10 = vpack.i.bf16 %v1591_v48, %v1590_v47 }
  0xb9   : > { %v1966_v9 = vpack.c.bf16 %v2074_v5, %v2073_v6  ;;  %v2447_v6 = vld [vmem:[#allocation2] sm:$0x1] }
 0x10c   : > { %v267_v14 = vpop.f32.mrb[0].mxu0 }
 0x10d   : > { %v268_v15 = vadd.f32 %v267_v14, %v196_v13  ;;  %v1756_v16 = vpop.f32.mrb[1].mxu0 }
 0x10f   : > { %v271_v17 = vmax.f32 %v268_v15, 0.0 }
 0x111   : > { %1766 = vmatmul.mubr.msk.f32.vlgmr.msra.gmra.mrb[0].mxu1 %vm282_vm2, %v271_v17 }
 0x112   : > { %1805 = vmatprep.mubr.msk.f32.mxu1 %vm2193_vm0, %v2194_v3  ;;  %1949 = vmatpush3.bf16.msra.mxu1 %v1654_v21 }
 0x113   : > { %1950 = vmatprep.subr.bf16.mxu1 %v2192_v2 }
 0x116   : > { %1952 = vmatpush3.bf16.msra.mxu1 %v1655_v22 }
 0x117   : > { %1953 = vmatprep.subr.bf16.mxu1 %v2192_v2 }
 0x11a   : > { %1955 = vmatpush3.bf16.msra.mxu1 %v1656_v23  ;;  %v1578_v23 = vunpack.c.l.bf16 %v2309_v8 }
 0x11b   : > { %1956 = vmatprep.subr.bf16.mxu1 %v2192_v2 }
 0x11c   : > { %v2075_v34 = vpack.i.bf16 %v1579_v24, %v1578_v23 }
 0x11e   : > { %1958 = vmatpush3.bf16.msra.mxu1 %v1657_v36  ;;  %2076 = vrot.lane.b32.xlu1 %v2075_v34, %s2196_s15 }
 0x11f   : > { %1965 = vmatprep.subr.bf16.mxu1 %v2192_v2 }
 0x190   : > { %v2077_v12 = vpop.permute.xlu1 %2076 }
 0x191   : > { %v2079_v18 = vunpack.i.h.bf16 %v2077_v12 }
 0x1e4   : > { %v352_v27 = vpop.f32.mrb[0].mxu1 }
 0x1e5   : > { %v2349_v28 = vadd.f32 %v352_v27, %v2344_v25  ;;  %v1767_v29 = vpop.f32.mrb[1].mxu1 }
 0x1e6   : > { %v1586_v29 = vunpack.c.l.bf16 %v2319_v11 }
 0x1e7   : > { %v356_v30 = vmax.f32 %v2349_v28, 0.0 }
 0x1e9   : > { %v365_v32 = vsel %vm282_vm2, %v356_v30, %v2346_v26 }
 0x1ea   : > { %v367_v33 = vsel %vm366_vm3, %v365_v32, %v2352_v31  ;;  %v1587_v32 = vunpack.c.h.bf16 %v2319_v11 }
 0x1eb   : > { %1787 = vmatmul.mubr.msk.f32.vlgmr.msra.gmra.mrb[2].mxu0 %vm388_vm4, %v367_v33 }
 0x1ec   : > { %1816 = vmatprep.mubr.msk.f32.mxu0 %vm2193_vm0, %v2194_v3  ;;  %1961 = vmatpush3.bf16.msra.mxu0 %v1960_v45  ;;  %v2085_v36 = vpack.i.bf16 %v1587_v32, %v1586_v29 }
 0x1ed   : > { %1962 = vmatprep.subr.bf16.mxu0 %v2192_v2 }
 0x1ee   : > { %2086 = vrot.lane.b32.xlu1 %v2085_v36, %s2196_s15 }
 0x1f0   : > { %1964 = vmatpush3.bf16.msra.mxu0 %v1963_v51 }
 0x1f1   : > { %1980 = vmatprep.subr.bf16.mxu0 %v2192_v2 }
 0x1f2   : > { %692 = vrot.lane.b32.xlu1 %v196_v13, %s2197_s16  ;;  %v189_v13 = vld [vmem:[%s2272_s7 + $0x2] sm:$0x1] }
 0x1f6   : > { %2096 = vrot.lane.b32.xlu1 %v2368_v39, %s2196_s15 }
 0x1fa   : > { %808 = vrot.lane.b32.xlu1 %v387_v46, %s2196_s15 }
 0x1fe   : > { %2111 = vrot.lane.b32.xlu1 %v2374_v40, %s2195_s13 }
 0x260   : > { %v2087_v19 = vpop.permute.xlu1 %2086 }
 0x261   : > { %v2089_v55 = vunpack.i.h.bf16 %v2087_v19 }
 0x2be   : > { %v458_v50 = vpop.f32.mrb[2].mxu0 }
 0x2bf   : > { %v459_v52 = vadd.f32 %v458_v50, %v387_v46  ;;  %v1788_v53 = vpop.f32.mrb[3].mxu0  ;;  %v2078_v50 = vunpack.i.l.bf16 %v2077_v12 }
 0x2c1   : > { %v462_v54 = vmax.f32 %v459_v52, 0.0  ;;  %v1969_v46 = vpack.c.bf16 %v2079_v18, %v2078_v50  ;;  %v1658_v50 = vld [vmem:[#allocation3 + $0x78] sm:$0xff]  }
 0x2c3   : > { %1806 = vmatmul.mubr.msk.f32.vlgmr.msra.gmra.mrb[2].mxu1 %vm366_vm3, %v462_v54 }
 0x2c4   : > { %1823 = vmatprep.mubr.msk.f32.mxu1 %vm2193_vm0, %v2194_v3  ;;  %1967 = vmatpush3.bf16.msra.mxu1 %v1966_v9 }
 0x2c5   : > { %1968 = vmatprep.subr.bf16.mxu1 %v2192_v2 }
 0x396   : > { %v550_v57 = vpop.f32.mrb[2].mxu1 }
 0x397   : > { %v2388_v58 = vadd.f32 %v550_v57, %v480_v56  ;;  %v1807_v59 = vpop.f32.mrb[3].mxu1  ;;  %v2088_v56 = vunpack.i.l.bf16 %v2087_v19 }
 0x399   : > { %v554_v60 = vmax.f32 %v2388_v58, 0.0  ;;  %v1975_v61 = vpack.c.bf16 %v2089_v55, %v2088_v56 }
 0x39b   : > { %1817 = vmatmul.mubr.msk.f32.vlgmr.msra.gmra.mrb[4].mxu0 %vm282_vm2, %v554_v60 }
 0x39c   : > { %1855 = vmatprep.mubr.msk.f32.mxu0 %vm2193_vm0, %v2194_v3 }
 0x46e   : > { %v658_v7 = vpop.f32.mrb[4].mxu0 }
 0x46f   : > { %v2399_v14 = vadd.f32 %v658_v7, %v587_v4  ;;  %v1818_v15 = vpop.f32.mrb[5].mxu0  ;;  %v693_v4 = vpop.permute.xlu1 %692 }
 0x471   : > { %v663_v16 = vand.u32 2147483647, %v2399_v14  ;;  %v662_v8 = vmax.f32 %v2399_v14, 0.0 }
 0x473   : > { %v664_v17 = vsub.f32 0.0, %v663_v16  ;;  %v2097_v7 = vpop.permute.xlu1 %2096 }
 0x474   : > { %v2099_v9 = vunpack.i.h.bf16 %v2097_v7  ;;  %v2098_v15 = vunpack.i.l.bf16 %v2097_v7 }
 0x475   : > { %v665_v21 = vmul.f32 1.442695, %v664_v17 }
 0x476   : > { %v1981_v17 = vpack.c.bf16 %v2099_v9, %v2098_v15  ;;  %v1664_v9 = vld [vmem:[#allocation3 + $0xa8] sm:$0xff]   ;;  %v1665_v15 = vld [vmem:[#allocation3 + $0xb0] sm:$0xff]  }
 0x477   : > { %2125 = vpow2.f32 %v665_v21  ;;  %v809_v34 = vpop.permute.xlu1 %808 }
 0x478   : > { %1982 = vmatpush3.bf16.msra.mxu0 %v1981_v17 }
 0x479   : > { %1983 = vmatprep.subr.bf16.mxu0 %v2192_v2 }
 0x481   : > { %v2126_v1 = vpop.eup %2125 }
 0x482   : > { %v667_v22 = vadd.f32 1.0, %v2126_v1  ;;  %v670_v27 = vmul.f32 -0.5, %v2126_v1  ;;  %v673_v35 = vand.u32 2147483647, %v2126_v1 }
 0x484   : > { %2127 = vlog2.f32 %v667_v22  ;;  %v671_v33 = vadd.f32 1.0, %v670_v27  ;;  %vm674_vm5 = vcmp.lt.f32.partialorder %v673_v35, 0.0004427343 }
 0x486   : > { %v672_v41 = vmul.f32 %v2126_v1, %v671_v33 }
 0x48e   : > { %v2128_v37 = vpop.eup %2127 }
 0x48f   : > { %v669_v38 = vmul.f32 0.6931472, %v2128_v37 }
 0x491   : > { %v675_v45 = vsel %vm674_vm5, %v672_v41, %v669_v38  ;;  %v2112_v41 = vpop.permute.xlu1 %2111 }
 0x492   : > { %v2412_v11 = vadd.f32 %v675_v45, %v662_v8  ;;  %v2114_v45 = vunpack.i.h.bf16 %v2112_v41  ;;  %v2113_v47 = vunpack.i.l.bf16 %v2112_v41 }
 0x494   : > { %678 = vrot.lane.b32.xlu0 %v2412_v11, %s2198_s17 }
 0x498   : > { %2081 = vrot.lane.b32.xlu0 %v2080_v49, %s2196_s15 }
 0x49c   : > { %2091 = vrot.lane.b32.xlu0 %v2090_v10, %s2196_s15 }
 0x4a0   : > { %796 = vrot.lane.b32.xlu0 %v385_v20, %s2196_s15 }
 0x4a4   : > { %2101 = vrot.lane.b32.xlu0 %v2374_v40, %s2196_s15 }
 0x4a8   : > { %2106 = vrot.lane.b32.xlu0 %v2368_v39, %s2195_s13 }
 0x4ac   : > { %897 = vrot.lane.b32.xlu0 %v2344_v25, %s2196_s15 }
 0x4b0   : > { %1069 = vrot.lane.b32.xlu0 %v2447_v6, %s2196_s15 }
 0x506   : > { %v679_v51 = vpop.permute.xlu0 %678 }
 0x507   : > { %v681_v42 = vmul.f32 %v679_v51, %v189_v13  ;;  %v1659_v51 = vld [vmem:[#allocation3 + $0x80] sm:$0xff]  }
 0x509   : > { %v682_v52 = vadd.f32 %v681_v42, %v2399_v14  ;;  %v1660_v42 = vld [vmem:[#allocation3 + $0x88] sm:$0xff]  }
 0x50a   : > { %v2082_v20 = vpop.permute.xlu0 %2081 }
 0x50b   : > { %1824 = vmatmul.mubr.msk.f32.vlgmr.msra.gmra.mrb[4].mxu1 %vm197_vm1, %v682_v52  ;;  %v2084_v53 = vunpack.i.h.bf16 %v2082_v20  ;;  %v2083_v54 = vunpack.i.l.bf16 %v2082_v20  ;;  %v1662_v52 = vld [vmem:[#allocation3 + $0x98] sm:$0xff]   ;;  %v1663_v20 = vld [vmem:[#allocation3 + $0xa0] sm:$0xff]  }
 0x50c   : > { %1970 = vmatpush3.bf16.msra.mxu1 %v1969_v46  ;;  %1844 = vmatprep.mubr.msk.f32.mxu1 %vm2193_vm0, %v2194_v3  ;;  %v1661_v46 = vld [vmem:[#allocation3 + $0x90] sm:$0xff]  }
 0x50d   : > { %v1972_v57 = vpack.c.bf16 %v2084_v53, %v2083_v54  ;;  %1971 = vmatprep.subr.bf16.mxu1 %v2192_v2 }
 0x50e   : > { %v2092_v59 = vpop.permute.xlu0 %2091 }
 0x50f   : > { %v2094_v62 = vunpack.i.h.bf16 %v2092_v59  ;;  %v2093_v63 = vunpack.i.l.bf16 %v2092_v59 }
 0x510   : > { %1973 = vmatpush3.bf16.msra.mxu1 %v1972_v57 }
 0x511   : > { %1974 = vmatprep.subr.bf16.mxu1 %v2192_v2  ;;  %v1978_v0 = vpack.c.bf16 %v2094_v62, %v2093_v63 }
 0x512   : > { %v797_v5 = vpop.permute.xlu0 %796 }
 0x514   : > { %1976 = vmatpush3.bf16.msra.mxu1 %v1975_v61 }
 0x515   : > { %1977 = vmatprep.subr.bf16.mxu1 %v2192_v2 }
 0x516   : > { %v2102_v16 = vpop.permute.xlu0 %2101 }
 0x517   : > { %v2104_v21 = vunpack.i.h.bf16 %v2102_v16  ;;  %v2103_v1 = vunpack.i.l.bf16 %v2102_v16  ;;  %v1666_v16 = vld [vmem:[#allocation3 + $0xb8] sm:$0xff]  }
 0x518   : > { %1979 = vmatpush3.bf16.msra.mxu1 %v1978_v0 }
 0x519   : > { %1842 = vmatprep.subr.mxu1 %v2194_v3  ;;  %v1984_v22 = vpack.c.bf16 %v2104_v21, %v2103_v1 }
 0x51a   : > { %v2107_v35 = vpop.permute.xlu0 %2106 }
 0x51b   : > { %1985 = vmatpush3.bf16.msra.mxu0 %v1984_v22  ;;  %v2109_v36 = vunpack.i.h.bf16 %v2107_v35  ;;  %v2108_v37 = vunpack.i.l.bf16 %v2107_v35 }
 0x51c   : > { %1843 = vmatpush3.msra.mxu1 %v797_v5  ;;  %1986 = vmatprep.subr.bf16.mxu0 %v2192_v2 }
 0x51d   : > { %2010 = vmatprep.subr.bf16.mxu1 %v2192_v2  ;;  %v1987_v8 = vpack.c.bf16 %v2109_v36, %v2108_v37 }
 0x51e   : > { %v898_v49 = vpop.permute.xlu0 %897 }
 0x522   : > { %v1070_v54 = vpop.permute.xlu0 %1069 }
 0x5de   : > { %v764_v23 = vpop.f32.mrb[4].mxu1 }
 0x5df   : > { %v765_v24 = vadd.f32 %v764_v23, %v693_v4  ;;  %v1825_v27 = vpop.f32.mrb[5].mxu1 }
 0x5e1   : > { %v768_v29 = vmax.f32 %v765_v24, 0.0 }
 0x5e3   : > { %v769_v32 = vsel %vm282_vm2, %v768_v29, %v2346_v26  ;;  %1063 = vrot.lane.b32.xlu1 %v768_v29, %s2195_s13 }
 0x5e4   : > { %v770_v33 = vsel %vm366_vm3, %v769_v32, %v2352_v31  ;;  %v1990_v31 = vpack.c.bf16 %v2114_v45, %v2113_v47 }
 0x5e5   : > { %1845 = vmatmul.mubr.msk.f32.vlgmr.msra.gmra.mrb[6].mxu1 %vm388_vm4, %v770_v33 }
 0x5e6   : > { %1912 = vmatprep.mubr.msk.f32.mxu1 %vm2193_vm0, %v2194_v3  ;;  %2012 = vmatpush3.bf16.msra.mxu1 %v1664_v9  ;;  %v1418_v9 = vmul.f32 %v2412_v11, %v2412_v11 }
 0x5e7   : > { %2013 = vmatprep.subr.bf16.mxu1 %v2192_v2 }
 0x5ea   : > { %2015 = vmatpush3.bf16.msra.mxu1 %v1665_v15 }
 0x5eb   : > { %2016 = vmatprep.subr.bf16.mxu1 %v2192_v2 }
 0x5ee   : > { %2018 = vmatpush3.bf16.msra.mxu1 %v1666_v16 }
 0x5ef   : > { %2019 = vmatprep.subr.bf16.mxu1 %v2192_v2 }
 0x655   : > { %v1064_v19 = vpop.permute.xlu1 %1063 }
 0x656   : > { %v1066_v53 = vsel %vm282_vm2, %v356_v30, %v1064_v19 }
 0x657   : > { %v1072_v55 = vsel %vm366_vm3, %v1066_v53, %v1070_v54 }
 0x6b8   : > { %v880_v38 = vpop.f32.mrb[6].mxu1 }
 0x6b9   : > { %v881_v43 = vadd.f32 %v880_v38, %v809_v34  ;;  %v1846_v44 = vpop.f32.mrb[7].mxu1 }
 0x6bb   : > { %v884_v48 = vmax.f32 %v881_v43, 0.0 }
 0x6bd   : > { %1856 = vmatmul.mubr.msk.f32.vlgmr.msra.gmra.mrb[6].mxu0 %vm282_vm2, %v884_v48 }
 0x6be   : > { %1988 = vmatpush3.bf16.msra.mxu0 %v1987_v8  ;;  %1866 = vmatprep.mubr.msk.f32.mxu0 %vm2193_vm0, %v2194_v3 }
 0x6bf   : > { %1989 = vmatprep.subr.bf16.mxu0 %v2192_v2 }
 0x6c2   : > { %1991 = vmatpush3.bf16.msra.mxu0 %v1990_v31 }
 0x6c3   : > { %1992 = vmatprep.subr.bf16.mxu0 %v2192_v2 }
 0x790   : > { %v969_v10 = vpop.f32.mrb[6].mxu0 }
 0x791   : > { %v970_v12 = vadd.f32 %v969_v10, %v898_v49  ;;  %v1857_v13 = vpop.f32.mrb[7].mxu0 }
 0x793   : > { %v973_v18 = vmax.f32 %v970_v12, 0.0 }
 0x795   : > { %1867 = vmatmul.mubr.msk.f32.vlgmr.msra.gmra.mrb[8].mxu0 %vm282_vm2, %v973_v18 }
 0x796   : > { %1994 = vmatpush3.bf16.msra.mxu0 %v1658_v50  ;;  %1893 = vmatprep.mubr.msk.f32.mxu0 %vm2193_vm0, %v2194_v3 }
 0x797   : > { %1995 = vmatprep.subr.bf16.mxu0 %v2192_v2 }
 0x79a   : > { %1997 = vmatpush3.bf16.msra.mxu0 %v1659_v51 }
 0x79b   : > { %1998 = vmatprep.subr.bf16.mxu0 %v2192_v2 }
 0x79e   : > { %2000 = vmatpush3.bf16.msra.mxu0 %v1660_v42 }
 0x79f   : > { %2001 = vmatprep.subr.bf16.mxu0 %v2192_v2 }
 0x7a2   : > { %2003 = vmatpush3.bf16.msra.mxu0 %v1661_v46 }
 0x7a3   : > { %2004 = vmatprep.subr.bf16.mxu0 %v2192_v2 }
 0x7a6   : > { %2006 = vmatpush3.bf16.msra.mxu0 %v1662_v52 }
 0x7a7   : > { %2007 = vmatprep.subr.bf16.mxu0 %v2192_v2 }
 0x7aa   : > { %2009 = vmatpush3.bf16.msra.mxu0 %v1663_v20 }
 0x7ad   : > { %1894 = vmatmul.mubr.msk.f32.vlgmr.msra.gmra.mrb[10].mxu0 %vm1097_vm6, %v1072_v55 }
 0x868   : > { %v2479_v56 = vpop.f32.mrb[8].mxu0 }
 0x869   : > { %v1868_v57 = vpop.f32.mrb[9].mxu0 }
 0x880   : > { %v1167_v59 = vpop.f32.mrb[10].mxu0 }
 0x881   : > { %1176 = vrot.lane.b32.xlu1 %v1167_v59, %s2195_s13  ;;  %v1895_v61 = vpop.f32.mrb[11].mxu0  ;;  %v1171_v62 = vmul.f32 0.5, %v1167_v59 }
 0x883   : > { %2129 = vtanh.f32 %v1171_v62 }
 0x88d   : > { %v2130_v63 = vpop.eup %2129 }
 0x88e   : > { %v1173_v0 = vmul.f32 0.5, %v2130_v63 }
 0x890   : > { %v1174_v28 = vadd.f32 0.5, %v1173_v0 }
 0x892   : > { %v1186_v1 = vsub.f32 1.0, %v1174_v28 }
 0x8f3   : > { %v1177_v4 = vpop.permute.xlu1 %1176 }
 0x8f4   : > { %v1179_v30 = vmul.f32 %v1177_v4, %v1174_v28 }
 0x8f6   : > { %1181 = vrot.lane.b32.xlu0 %v1179_v30, %s2196_s15 }
 0x8fa   : > { %1192 = vrot.lane.b32.xlu0 %v2447_v6, %s2195_s13  ;;  %v1667_v6 = vld [vmem:[#allocation3 + $0xc0] sm:$0xff]  }
 0x8fb   : > { %2021 = vmatpush3.bf16.msra.mxu1 %v1667_v6 }
 0x8fc   : > { %2022 = vmatprep.subr.bf16.mxu1 %v2192_v2 }
 0x968   : > { %v1182_v5 = vpop.permute.xlu0 %1181 }
 0x969   : > { %v1184_v7 = vadd.f32 %v1182_v5, %v1167_v59 }
 0x96b   : > { %2131 = vtanh.f32 %v1184_v7 }
 0x96c   : > { %v1193_v21 = vpop.permute.xlu0 %1192 }
 0x96d   : > { %v1195_v23 = vmul.f32 %v1193_v21, %v1174_v28 }
 0x975   : > { %v2132_v17 = vpop.eup %2131 }
 0x976   : > { %1188 = vrot.lane.b32.xlu1 %v2132_v17, %s2197_s16 }
 0x9e8   : > { %v1189_v22 = vpop.permute.xlu1 %1188 }
 0x9e9   : > { %v1191_v24 = vmul.f32 %v1189_v22, %v1186_v1 }
 0x9eb   : > { %v1196_v27 = vadd.f32 %v1195_v23, %v1191_v24 }
 0x9ed   : > { %1198 = vrot.lane.b32.xlu1 %v1196_v27, %s2197_s16 }
 0xa5f   : > { %v1199_v29 = vpop.permute.xlu1 %1198 }
 0xa60   : > { %v1201_v32 = vsel %vm282_vm2, %v1199_v29, %v2346_v26  ;;  %1458 = vst.msk [vmem:[#allocation2] sm:$0x1] %vm1457_vm7, %v1199_v29  ;;  %1472 = vst.msk [vmem:[%s2277_s10 + $0x1] sm:$0x1] %vm1457_vm7, %v1199_v29 }
 0xa61   : > { %1913 = vmatmul.mubr.msk.f32.vlgmr.msra.gmra.mrb[8].mxu1 %vm366_vm3, %v1201_v32 }
 0xa62   : > { %1923 = vmatprep.mubr.msk.f32.mxu1 %vm2193_vm0, %v2194_v3 }
 0xb34   : > { %v1287_v33 = vpop.f32.mrb[8].mxu1 }
 0xb35   : > { %1296 = vrot.lane.b32.xlu0 %v1287_v33, %s2195_s13  ;;  %v1914_v34 = vpop.f32.mrb[9].mxu1  ;;  %v1291_v35 = vmul.f32 0.5, %v1287_v33 }
 0xb37   : > { %2133 = vtanh.f32 %v1291_v35 }
 0xb38   : > { %2135 = vlog2.f32 %v2412_v11 }
 0xb41   : > { %v2134_v36 = vpop.eup %2133 }
 0xb42   : > { %v1293_v37 = vmul.f32 0.5, %v2134_v36  ;;  %v2136_v8 = vpop.eup %2135 }
 0xb43   : > { %v1411_v31 = vmul.f32 0.6931472, %v2136_v8 }
 0xb44   : > { %v1294_v38 = vadd.f32 0.5, %v1293_v37 }
 0xb45   : > { %v1412_v49 = vmul.f32 2.0, %v1411_v31 }
 0xb46   : > { %v1306_v54 = vsub.f32 1.0, %v1294_v38  ;;  %v1312_v57 = vmul.f32 %v1294_v38, %v2346_v26 }
 0xba7   : > { %v1297_v41 = vpop.permute.xlu0 %1296 }
 0xba8   : > { %v1299_v43 = vmul.f32 %v1297_v41, %v1294_v38 }
 0xbaa   : > { %1301 = vrot.lane.b32.xlu1 %v1299_v43, %s2196_s15 }
 0xbae   : > { %1420 = vrot.lane.b32.xlu1 %v2388_v58, %s2197_s16 }
 0xbb2   : > { %2121 = vrot.lane.b32.xlu1 %v2374_v40, %s2199_s18  ;;  %v555_v40 = vand.u32 2147483647, %v2388_v58 }
 0xbb4   : > { %v556_v12 = vsub.f32 0.0, %v555_v40 }
 0xbb6   : > { %v557_v13 = vmul.f32 1.442695, %v556_v12 }
 0xc1c   : > { %v1302_v3 = vpop.permute.xlu1 %1301 }
 0xc1d   : > { %v1304_v44 = vadd.f32 %v1302_v3, %v1287_v33 }
 0xc1f   : > { %2137 = vtanh.f32 %v1304_v44 }
 0xc20   : > { %v1421_v45 = vpop.permute.xlu1 %1420  ;;  %2139 = vpow2.f32 %v557_v13 }
 0xc21   : > { %v1423_v47 = vsub.f32 %v2399_v14, %v1421_v45 }
 0xc23   : > { %v1424_v48 = vmul.f32 %v1423_v47, %v1423_v47 }
 0xc24   : > { %v2122_v62 = vpop.permute.xlu1 %2121 }
 0xc25   : > { %1426 = vrot.lane.b32.xlu1 %v1424_v48, %s2199_s18  ;;  %v2124_v0 = vunpack.i.h.bf16 %v2122_v62  ;;  %v2123_v28 = vunpack.i.l.bf16 %v2122_v62 }
 0xc29   : > { %v2138_v10 = vpop.eup %2137  ;;  %1414 = vrot.lane.b32.xlu1 %v1412_v49, %s2195_s13 }
 0xc2a   : > { %1308 = vrot.lane.b32.xlu0 %v2138_v10, %s2197_s16  ;;  %v2140_v18 = vpop.eup %2139 }
 0xc2b   : > { %v559_v14 = vadd.f32 1.0, %v2140_v18  ;;  %v562_v50 = vmul.f32 -0.5, %v2140_v18  ;;  %v565_v46 = vand.u32 2147483647, %v2140_v18 }
 0xc2d   : > { %2141 = vlog2.f32 %v559_v14  ;;  %v563_v42 = vadd.f32 1.0, %v562_v50  ;;  %vm566_vm8 = vcmp.lt.f32.partialorder %v565_v46, 0.0004427343 }
 0xc2e   : > { %2116 = vrot.lane.b32.xlu0 %v2368_v39, %s2199_s18 }
 0xc2f   : > { %v564_v19 = vmul.f32 %v2140_v18, %v563_v42 }
 0xc37   : > { %v2142_v51 = vpop.eup %2141 }
 0xc38   : > { %v561_v52 = vmul.f32 0.6931472, %v2142_v51 }
 0xc3a   : > { %v567_v20 = vsel %vm566_vm8, %v564_v19, %v561_v52 }
 0xc3b   : > { %v568_v53 = vadd.f32 %v567_v20, %v554_v60  ;;  %v2026_v60 = vpack.c.bf16 %v2124_v0, %v2123_v28 }
 0xc3d   : > { %v1405_v39 = vmul.f32 %v568_v53, %v568_v53 }
 0xc3f   : > { %2143 = vrcp.f32 %v1405_v39 }
 0xc40   : > { %2145 = vlog2.f32 %v568_v53 }
 0xc49   : > { %v2144_v58 = vpop.eup %2143 }
 0xc4a   : > { %v2146_v6 = vpop.eup %2145 }
 0xc97   : > { %v1427_v26 = vpop.permute.xlu1 %1426 }
 0xc98   : > { %v1429_v15 = vadd.f32 %v1427_v26, %v1418_v9 }
 0xc9b   : > { %v1415_v21 = vpop.permute.xlu1 %1414 }
 0xc9c   : > { %v1309_v55 = vpop.permute.xlu0 %1308 }
 0xc9d   : > { %v1311_v59 = vmul.f32 %v1309_v55, %v1306_v54 }
 0xc9f   : > { %v1313_v61 = vadd.f32 %v1312_v57, %v1311_v59 }
 0xca0   : > { %v2117_v63 = vpop.permute.xlu0 %2116 }
 0xca1   : > { %1315 = vrot.lane.b32.xlu0 %v1313_v61, %s2197_s16  ;;  %v2119_v4 = vunpack.i.h.bf16 %v2117_v63  ;;  %v2118_v30 = vunpack.i.l.bf16 %v2117_v63 }
 0xca3   : > { %v2023_v5 = vpack.c.bf16 %v2119_v4, %v2118_v30 }
 0xca5   : > { %1431 = vrot.lane.b32.xlu0 %v2144_v58, %s2197_s16  ;;  %2024 = vmatpush3.bf16.msra.mxu1 %v2023_v5 }
 0xca6   : > { %2025 = vmatprep.subr.bf16.mxu1 %v2192_v2  ;;  %v1408_v2 = vmul.f32 0.6931472, %v2146_v6 }
 0xca8   : > { %v1409_v1 = vmul.f32 2.0, %v1408_v2 }
 0xca9   : > { %2027 = vmatpush3.bf16.msra.mxu1 %v2026_v60 }
 0xcaa   : > { %v1417_v22 = vsub.f32 %v1409_v1, %v1415_v21 }
 0xd13   : > { %v1316_v7 = vpop.permute.xlu0 %1315 }
 0xd14   : > { %1460 = vst.msk [vmem:[#allocation2 + $0x1] sm:$0x1] %vm1457_vm7, %v1316_v7  ;;  %1473 = vst.msk [vmem:[%s2277_s10 + $0x2] sm:$0x1] %vm1457_vm7, %v1316_v7  ;;  %1924 = vmatmul.mubr.msk.f32.vlgmr.msra.gmra.mrb[10].mxu1 %vm282_vm2, %v1316_v7 }
 0xd17   : > { %v1432_v16 = vpop.permute.xlu0 %1431 }
 0xd18   : > { %v1434_v17 = vmul.f32 %v1432_v16, %v1429_v15 }
 0xd1a   : > { %1436 = vrot.lane.b32.xlu0 %v1434_v17, %s2195_s13 }
 0xd8c   : > { %v1437_v23 = vpop.permute.xlu0 %1436 }
 0xd8d   : > { %v1439_v24 = vadd.f32 %v1437_v23, %v1417_v22 }
 0xd8f   : > { %v1561_v11 = vadd.f32 -1.0, %v1439_v24 }
 0xd91   : > { %1442 = vrot.lane.b32.xlu1 %v1561_v11, %s2200_s19 }
 0xd95   : > { %1329 = vrot.lane.b32.xlu1 %v2344_v25, %s2199_s18 }
 0xd99   : > { %986 = vrot.lane.b32.xlu1 %v2344_v25, %s2195_s13 }
 0xde7   : > { %v1400_v27 = vpop.f32.mrb[10].mxu1 }
 0xde8   : > { %v1925_v29 = vpop.f32.mrb[11].mxu1 }
 0xe03   : > { %v1443_v32 = vpop.permute.xlu1 %1442 }
 0xe04   : > { %v1446_v33 = vsel %vm1445_vm9, %v1443_v32, 0.0 }
 0xe05   : > { %1447 = vadd.xlane.f32.xlu0 %v1446_v33 }
 0xe07   : > { %v1330_v34 = vpop.permute.xlu1 %1329 }
 0xe08   : > { %v1401_v35 = vadd.f32 %v1400_v27, %v1330_v34 }
 0xe0a   : > { %2147 = vtanh.f32 %v1401_v35 }
 0xe0b   : > { %v987_v36 = vpop.permute.xlu1 %986 }
 0xe0c   : > { %v1059_v37 = vadd.f32 %v2479_v56, %v987_v36 }
 0xe0e   : > { %1462 = vst.msk [vmem:[%s2277_s10] sm:$0x1] %vm1445_vm9, %v1059_v37 }
 0xe14   : > { %v2148_v38 = vpop.eup %2147 }
 0xe15   : > { %1464 = vrot.lane.b32.xlu1 %v2148_v38, %s2199_s18 }
 0xe87   : > { %v1465_v25 = vpop.permute.xlu1 %1464 }
 0xe88   : > { %1468 = vst.msk [vmem:[%s2277_s10] sm:$0x1] %vm1467_vm10, %v1465_v25 }
 0xe92   : > { %v1448_v41 = vpop.xlane.xlu0 %1447 }
 0xe93   : > { %v1449_v43 = vrot.slane %v1448_v41, 4 }
 0xe95   : > { %v1450_v3 = vadd.f32 %v1449_v43, %v1448_v41 }
 0xe97   : > { %v1451_v44 = vrot.slane %v1450_v3, 2 }
 0xe99   : > { %v1452_v8 = vadd.f32 %v1451_v44, %v1450_v3 }
 0xe9b   : > { %v1453_v45 = vrot.slane %v1452_v8, 1 }
 0xe9d   : > { %v1454_v47 = vadd.f32 %v1453_v45, %v1452_v8 }
 0xe9f   : > { %2028 = vpush %v1454_v47 }
 0xed0   : > { %s2029_s20 = spop %2028 }
 0xed1   : > { %s1456_s21 = smul.f32 0.5, %s2029_s20 }
 0xed3   : > { %v1469_v56 = vstv %s1456_s21 }
 0xed4   : > { %1471 = vst.msk [vmem:[%s2277_s10] sm:$0x1] %vm1470_vm11, %v1469_v56 }
 0xed5 PF: > { %s14_s12 = sadd.s32 1, %s2187_s12  }
 0xed6   : > { %p11_p4 = scmp.ge.s32.totalorder %s14_s12, 10  }
 0xed8   :  { %13 = sbr.rel (!%p11_p4) target bundleno = 1 (0x1), region = 71 }
 0xedf   :  { %1493 = vsyncpa [#allocation4], 1 }
 0xee0   :  { %1495 = vsyncpa [#allocation4 + $0x1], 1 }

</bundles_post_ra>
